<compile_context>
chip_gen: v6e
topology: v6e:2x2x1
jax: 0.10.0
libtpu: 0.0.40
codegen_flags: <defaults>
</compile_context>

<pallas_src>
import functools

import jax
import jax.numpy as jnp
from jax.experimental import pallas as pl
from jax.experimental.pallas import tpu as pltpu

# ----- stand-in for the `Constant` module C ------------------------------------
NUM_OF_QUESTIONS = 16          # C.NUM_OF_QUESTIONS
EMB = 32                       # C.EMB
HIDDEN_DIM = 32
LAYER_DIM = 1                  # TODO(synk): fused kernel implements layer_dim == 1 only.
BATCH = 2
SEQ = 8
N_NODES = 2 * NUM_OF_QUESTIONS  # rows of the question embedding table


# ================================ fused kernel ===================================

def dkt_fused_kernel(
    x_ref,                                        # (T*B, NN) time-major flattened input
    ques_ref, g_ref, adj_in_ref, adj_out_ref,     # embedding table + graphs
    hw1_ref, hb1_ref, hw2_ref, hb2_ref,           # HGNN
    ow1_ref, ob1_ref, ow2_ref, ob2_ref,           # GCN net1 (adj_out)
    iw1_ref, ib1_ref, iw2_ref, ib2_ref,           # GCN net2 (adj_in)
    wih_all_ref, gi_bias_ref,                     # (2E, 6H), (1, 6H)  block-diag input proj
    whh_all_ref, bhh_n_ref,                       # (2H, 6H), (1, 2H)  block-diag recurrence
    whead_ref, bhead_ref,                         # (2H, 2NQ+H), (1, 2NQ+H)  fused heads
    fce_w_ref, fce_b_ref,                         # (2H, NQ), (1, NQ)  ensemble head
    out_ref,                                      # (3, T*B, NQ)  [logit_c, logit_t, logit_e]
    hid_scratch,                                  # VMEM (T*B, 2H)   [out_h | out_d]
    *, batch, seq, hidden, nq):

    f32 = jnp.float32
    B, H = batch, hidden

    def mm(a, b):
        return jnp.dot(a, b, preferred_element_type=f32)

    ques = ques_ref[...]
    g = g_ref[...]

    # ---- HGNN: ques_h = G @ (relu(G @ (ques @ W1 + b1)) @ W2 + b2) ----------------
    h = mm(ques, hw1_ref[...]) + hb1_ref[...]
    h = jnp.maximum(mm(g, h), 0.0)
    h = mm(h, hw2_ref[...]) + hb2_ref[...]
    ques_h = mm(g, h)

    # ---- dual GCN: adj @ (x @ W) + b, relu between layers -------------------------
    def gcn(adj, w1, b1, w2, b2):
        s = mm(ques, w1)
        s = jnp.maximum(mm(adj, s) + b1, 0.0)
        s = mm(s, w2)
        return mm(adj, s) + b2

    q_out = gcn(adj_out_ref[...], ow1_ref[...], ob1_ref[...], ow2_ref[...], ob2_ref[...])
    q_in = gcn(adj_in_ref[...], iw1_ref[...], ib1_ref[...], iw2_ref[...], ib2_ref[...])
    ques_d = jnp.concatenate([q_in, q_out], axis=-1)       # torch.cat([ques_in, ques_out], -1)

    # ---- 'choose 50': single fused projection  x_cat = [x @ ques_h | x @ ques_d] ---
    x = x_ref[...]                                          # (T*B, NN), time-major rows
    proj = jnp.concatenate([ques_h, ques_d], axis=-1)       # (NN, 2E)
    x_cat = mm(x, proj)                                     # (T*B, 2E)

    # ---- hoisted, fused GRU input projection: one (T*B,2E)x(2E,6H) matmul ----------
    # column layout: [ r1 | r2 | z1 | z2 | n1 | n2 ]  (each H wide; 1=rnn1, 2=rnn2)
    gi = mm(x_cat, wih_all_ref[...]) + gi_bias_ref[...]     # (T*B, 6H); b_ih (+ b_hh r/z) folded

    whh = whh_all_ref[...]                                  # (2H, 6H) block-diagonal
    bhh_n = jnp.broadcast_to(bhh_n_ref[...], (B, 2 * H))    # hoisted broadcast (b_hh n-gate)

    hcat = jnp.zeros((B, 2 * H), f32)                       # [h1 | h2]

    # Fully unrolled serial recurrence: one MXU push per step, both streams together.
    for t in range(seq):
        lo = t * B
        gh = mm(hcat, whh)                                  # (B, 6H)
        gi_t = gi[lo:lo + B]
        r = jax.nn.sigmoid(gi_t[:, 0:2 * H] + gh[:, 0:2 * H])
        z = jax.nn.sigmoid(gi_t[:, 2 * H:4 * H] + gh[:, 2 * H:4 * H])
        n = jnp.tanh(gi_t[:, 4 * H:6 * H] + r * (gh[:, 4 * H:6 * H] + bhh_n))
        hcat = (1.0 - z) * n + z * hcat
        hid_scratch[pl.ds(lo, B), :] = hcat                 # bounded live range, no concat

    hid = hid_scratch[...]                                  # (T*B, 2H) = [out_h | out_d]
    out_h = hid[:, :H]
    out_d = hid[:, H:]

    # ---- fused heads: [logit_c | logit_t | theta_pre] in one matmul ----------------
    head = mm(hid, whead_ref[...]) + bhead_ref[...]         # (T*B, 2NQ+H)
    theta = jax.nn.sigmoid(head[:, 2 * nq:])
    le = mm(jnp.concatenate([theta * out_d, (1.0 - theta) * out_h], axis=-1),
            fce_w_ref[...]) + fce_b_ref[...]

    out_ref[0, :, :] = head[:, :nq]                         # logit_c
    out_ref[1, :, :] = head[:, nq:2 * nq]                   # logit_t
    out_ref[2, :, :] = le                                   # ensemble logit


# ============================= wrapper (glue) =====================================

def _split_gru(lp, e_in, hidden):
    """PyTorch-layout GRU weights -> per-gate, pre-transposed for x @ W form."""
    H = hidden
    wih = jnp.transpose(lp["w_ih"].reshape(3, H, e_in), (0, 2, 1))   # (3, E_in, H)
    whh = jnp.transpose(lp["w_hh"].reshape(3, H, H), (0, 2, 1))      # (3, H, H)
    bih = lp["b_ih"].reshape(3, H)
    bhh = lp["b_hh"].reshape(3, H)
    return wih, whh, bih, bhh


def _pack_gru(lp_h, lp_d, emb, hidden):
    """Block-diagonal packing of both GRU streams; gate columns [r1|r2|z1|z2|n1|n2]."""
    H, E = hidden, emb
    wih_h, whh_h, bih_h, bhh_h = _split_gru(lp_h, E, H)
    wih_d, whh_d, bih_d, bhh_d = _split_gru(lp_d, E, H)

    z_eh = jnp.zeros((E, H), jnp.float32)
    z_hh = jnp.zeros((H, H), jnp.float32)

    wih_all = jnp.concatenate([
        jnp.concatenate([wih_h[0], z_eh, wih_h[1], z_eh, wih_h[2], z_eh], axis=1),
        jnp.concatenate([z_eh, wih_d[0], z_eh, wih_d[1], z_eh, wih_d[2]], axis=1),
    ], axis=0)                                                        # (2E, 6H)
    whh_all = jnp.concatenate([
        jnp.concatenate([whh_h[0], z_hh, whh_h[1], z_hh, whh_h[2], z_hh], axis=1),
        jnp.concatenate([z_hh, whh_d[0], z_hh, whh_d[1], z_hh, whh_d[2]], axis=1),
    ], axis=0)                                                        # (2H, 6H)
    gi_bias = jnp.concatenate([
        bih_h[0] + bhh_h[0], bih_d[0] + bhh_d[0],     # r (b_hh folded)
        bih_h[1] + bhh_h[1], bih_d[1] + bhh_d[1],     # z (b_hh folded)
        bih_h[2], bih_d[2],                           # n (b_hh kept separate)
    ])[None, :]                                                       # (1, 6H)
    bhh_n = jnp.concatenate([bhh_h[2], bhh_d[2]])[None, :]            # (1, 2H)
    return wih_all, whh_all, gi_bias, bhh_n


def _pack_head(p, hidden, nq):
    """Block weight so [logit_c | logit_t | theta_pre] is one matmul over [out_h|out_d]."""
    z = jnp.zeros((hidden, nq), jnp.float32)
    whead = jnp.concatenate([
        jnp.concatenate([p["fc_c_w"], z, p["w1_w"]], axis=1),         # out_h rows
        jnp.concatenate([z, p["fc_t_w"], p["w2_w"]], axis=1),         # out_d rows
    ], axis=0)                                                        # (2H, 2NQ+H)
    bhead = jnp.concatenate([p["fc_c_b"], p["fc_t_b"], p["w1_b"] + p["w2_b"]], axis=1)
    return whead, bhead                                               # (1, 2NQ+H)


@jax.jit
def dkt_forward(params, x, G, adj_in, adj_out):
    p = params
    B, T, NN = x.shape
    H = HIDDEN_DIM
    NQ = NUM_OF_QUESTIONS

    # Single (tiny) reorder to time-major so GRU step t reads a contiguous row block.
    x_tm = jnp.transpose(x, (1, 0, 2)).reshape(T * B, NN)

    wih_all, whh_all, gi_bias, bhh_n = _pack_gru(p["rnn1"][0], p["rnn2"][0], EMB, H)
    whead, bhead = _pack_head(p, H, NQ)

    out = pl.pallas_call(
        functools.partial(dkt_fused_kernel, batch=B, seq=T, hidden=H, nq=NQ),
        out_shape=jax.ShapeDtypeStruct((3, T * B, NQ), jnp.float32),
        scratch_shapes=[pltpu.VMEM((T * B, 2 * H), jnp.float32)],
        compiler_params=pltpu.CompilerParams(vmem_limit_bytes=64 * 1024 * 1024),
    )(x_tm,
      p["ques"], G, adj_in, adj_out,
      p["hgnn"]["w1"], p["hgnn"]["b1"], p["hgnn"]["w2"], p["hgnn"]["b2"],
      p["gcn_out"]["w1"], p["gcn_out"]["b1"], p["gcn_out"]["w2"], p["gcn_out"]["b2"],
      p["gcn_in"]["w1"], p["gcn_in"]["b1"], p["gcn_in"]["w2"], p["gcn_in"]["b2"],
      wih_all, gi_bias, whh_all, bhh_n,
      whead, bhead, p["fc_e_w"], p["fc_e_b"])

    out = jnp.transpose(out.reshape(3, T, B, NQ), (0, 2, 1, 3))       # (3, B, T, NQ)
    return out[0], out[1], out[2]


# ========================= deterministic parameter init ==========================

def init_params(key):
    keys = iter(jax.random.split(key, 64))

    def nrm(shape, scale=0.1):
        return (scale * jax.random.normal(next(keys), shape)).astype(jnp.float32)

    E, H, NQ = EMB, HIDDEN_DIM, NUM_OF_QUESTIONS

    def gru_params(e_in, h, layer_dim):
        layers = []
        for l in range(layer_dim):
            d = e_in if l == 0 else h
            layers.append(dict(w_ih=nrm((3 * h, d)), w_hh=nrm((3 * h, h)),
                               b_ih=nrm((1, 3 * h)), b_hh=nrm((1, 3 * h))))
        return layers

    params = dict(
        ques=nrm((N_NODES, E)),                                    # nn.Embedding table
        hgnn=dict(w1=nrm((E, E)), b1=nrm((1, E)),
                  w2=nrm((E, E)), b2=nrm((1, E))),                 # HGNN(E -> E -> E)
        gcn_out=dict(w1=nrm((E, E)), b1=nrm((1, E)),
                     w2=nrm((E, E // 2)), b2=nrm((1, E // 2))),    # GCN(E -> E -> E/2)
        gcn_in=dict(w1=nrm((E, E)), b1=nrm((1, E)),
                    w2=nrm((E, E // 2)), b2=nrm((1, E // 2))),
        rnn1=gru_params(E, H, LAYER_DIM),
        rnn2=gru_params(E, H, LAYER_DIM),
        # Linear weights stored pre-transposed as (in, out): y = x @ W + b
        fc_c_w=nrm((H, NQ)), fc_c_b=nrm((1, NQ)),
        fc_t_w=nrm((H, NQ)), fc_t_b=nrm((1, NQ)),
        fc_e_w=nrm((2 * H, NQ)), fc_e_b=nrm((1, NQ)),
        w1_w=nrm((H, H)), w1_b=nrm((1, H)),
        w2_w=nrm((H, H)), w2_b=nrm((1, H)),
    )
    return params


# ============================ pure-JAX reference ==================================

def reference_forward(params, x, G, adj_in, adj_out):
    p = params
    ques = p["ques"]
    H = HIDDEN_DIM

    h = jnp.maximum(G @ (ques @ p["hgnn"]["w1"] + p["hgnn"]["b1"]), 0.0)
    ques_h = G @ (h @ p["hgnn"]["w2"] + p["hgnn"]["b2"])

    def gcn(adj, gp):
        s = jnp.maximum(adj @ (ques @ gp["w1"]) + gp["b1"], 0.0)
        return adj @ (s @ gp["w2"]) + gp["b2"]

    ques_d = jnp.concatenate([gcn(adj_in, p["gcn_in"]), gcn(adj_out, p["gcn_out"])], -1)

    x_h = x @ ques_h
    x_d = x @ ques_d

    def gru_stack(xb, layers):
        seq = jnp.transpose(xb, (1, 0, 2))
        for lp in layers:
            def step(hprev, x_t, lp=lp):
                gi = x_t @ lp["w_ih"].T + lp["b_ih"]
                gh = hprev @ lp["w_hh"].T + lp["b_hh"]
                r = jax.nn.sigmoid(gi[:, :H] + gh[:, :H])
                z = jax.nn.sigmoid(gi[:, H:2 * H] + gh[:, H:2 * H])
                n = jnp.tanh(gi[:, 2 * H:] + r * gh[:, 2 * H:])
                hn = (1.0 - z) * n + z * hprev
                return hn, hn
            h0 = jnp.zeros((seq.shape[1], H), jnp.float32)
            _, seq = jax.lax.scan(step, h0, seq)
        return jnp.transpose(seq, (1, 0, 2))

    out_h = gru_stack(x_h, p["rnn1"])
    out_d = gru_stack(x_d, p["rnn2"])

    logit_c = out_h @ p["fc_c_w"] + p["fc_c_b"]
    logit_t = out_d @ p["fc_t_w"] + p["fc_t_b"]
    theta = jax.nn.sigmoid(out_h @ p["w1_w"] + p["w1_b"] + out_d @ p["w2_w"] + p["w2_b"])
    od = theta * out_d
    oh = (1.0 - theta) * out_h
    logit_e = jnp.concatenate([od, oh], -1) @ p["fc_e_w"] + p["fc_e_b"]
    return logit_c, logit_t, logit_e


# ==================================== main ========================================

if __name__ == "__main__":
    key = jax.random.PRNGKey(0)
    k_par, k_g, k_in, k_out, k_x = jax.random.split(key, 5)

    params = init_params(k_par)

    # deterministic (row-normalized) graph matrices
    def rand_adj(k):
        a = jax.random.uniform(k, (N_NODES, N_NODES), dtype=jnp.float32)
        return a / jnp.sum(a, axis=1, keepdims=True)

    G = rand_adj(k_g)
    adj_in = rand_adj(k_in)
    adj_out = rand_adj(k_out)

    # x: one-hot (question, correctness) indices over 2*NUM_OF_QUESTIONS
    ids = jax.random.randint(k_x, (BATCH, SEQ), 0, N_NODES)
    x = jax.nn.one_hot(ids, N_NODES, dtype=jnp.float32)   # (B, T, 2*NQ)

    logit_c, logit_t, logit_e = dkt_forward(params, x, G, adj_in, adj_out)
    jax.block_until_ready((logit_c, logit_t, logit_e))

    ref_c, ref_t, ref_e = reference_forward(params, x, G, adj_in, adj_out)
    assert logit_c.shape == (BATCH, SEQ, NUM_OF_QUESTIONS)
    assert logit_t.shape == (BATCH, SEQ, NUM_OF_QUESTIONS)
    assert logit_e.shape == (BATCH, SEQ, NUM_OF_QUESTIONS)
    assert jnp.allclose(logit_c, ref_c, atol=1e-2, rtol=1e-2)
    assert jnp.allclose(logit_t, ref_t, atol=1e-2, rtol=1e-2)
    assert jnp.allclose(logit_e, ref_e, atol=1e-2, rtol=1e-2)

    print("KERNEL_OK")
</pallas_src>

<mosaic_0001>
module attributes {stable_mosaic.version = 11 : i64} {
  func.func @dkt_fused_kernel(%arg0: memref<16x32xf32, #tpu.memory_space<vmem>>, %arg1: memref<32x32xf32, #tpu.memory_space<vmem>>, %arg2: memref<32x32xf32, #tpu.memory_space<vmem>>, %arg3: memref<32x32xf32, #tpu.memory_space<vmem>>, %arg4: memref<32x32xf32, #tpu.memory_space<vmem>>, %arg5: memref<32x32xf32, #tpu.memory_space<vmem>>, %arg6: memref<1x32xf32, #tpu.memory_space<vmem>>, %arg7: memref<32x32xf32, #tpu.memory_space<vmem>>, %arg8: memref<1x32xf32, #tpu.memory_space<vmem>>, %arg9: memref<32x32xf32, #tpu.memory_space<vmem>>, %arg10: memref<1x32xf32, #tpu.memory_space<vmem>>, %arg11: memref<32x16xf32, #tpu.memory_space<vmem>>, %arg12: memref<1x16xf32, #tpu.memory_space<vmem>>, %arg13: memref<32x32xf32, #tpu.memory_space<vmem>>, %arg14: memref<1x32xf32, #tpu.memory_space<vmem>>, %arg15: memref<32x16xf32, #tpu.memory_space<vmem>>, %arg16: memref<1x16xf32, #tpu.memory_space<vmem>>, %arg17: memref<64x192xf32, #tpu.memory_space<vmem>>, %arg18: memref<1x192xf32, #tpu.memory_space<vmem>>, %arg19: memref<64x192xf32, #tpu.memory_space<vmem>>, %arg20: memref<1x64xf32, #tpu.memory_space<vmem>>, %arg21: memref<64x64xf32, #tpu.memory_space<vmem>>, %arg22: memref<1x64xf32, #tpu.memory_space<vmem>>, %arg23: memref<64x16xf32, #tpu.memory_space<vmem>>, %arg24: memref<1x16xf32, #tpu.memory_space<vmem>>, %arg25: memref<3x16x16xf32, #tpu.memory_space<vmem>>, %arg26: memref<16x64xf32, #tpu.memory_space<vmem>>) attributes {dimension_semantics = [], scalar_prefetch = 0 : i64, scratch_operands = 1 : i64, tpu.core_type = #tpu.core_type<tc>} {
    %c0 = arith.constant 0 : index
    %c0_0 = arith.constant 0 : index
    %0 = vector.load %arg1[%c0, %c0_0] : memref<32x32xf32, #tpu.memory_space<vmem>>, vector<32x32xf32>
    %c0_1 = arith.constant 0 : index
    %c0_2 = arith.constant 0 : index
    %1 = vector.load %arg2[%c0_1, %c0_2] : memref<32x32xf32, #tpu.memory_space<vmem>>, vector<32x32xf32>
    %c0_3 = arith.constant 0 : index
    %c0_4 = arith.constant 0 : index
    %2 = vector.load %arg5[%c0_3, %c0_4] : memref<32x32xf32, #tpu.memory_space<vmem>>, vector<32x32xf32>
    %cst = arith.constant dense<0.000000e+00> : vector<32x32xf32>
    %3 = tpu.matmul %0, %2, %cst {dimension_numbers = #tpu.dot_dimension_numbers<[1], [0], [0], [1], [0, 0, 1, 1], [], []>} : vector<32x32xf32>, vector<32x32xf32>, vector<32x32xf32> -> vector<32x32xf32>
    %c0_5 = arith.constant 0 : index
    %c0_6 = arith.constant 0 : index
    %4 = vector.load %arg6[%c0_5, %c0_6] : memref<1x32xf32, #tpu.memory_space<vmem>>, vector<1x32xf32>
    %5 = vector.broadcast %4 : vector<1x32xf32> to vector<32x32xf32>
    %6 = arith.addf %3, %5 : vector<32x32xf32>
    %cst_7 = arith.constant dense<0.000000e+00> : vector<32x32xf32>
    %7 = tpu.matmul %1, %6, %cst_7 {dimension_numbers = #tpu.dot_dimension_numbers<[1], [0], [0], [1], [0, 0, 1, 1], [], []>} : vector<32x32xf32>, vector<32x32xf32>, vector<32x32xf32> -> vector<32x32xf32>
    %cst_8 = arith.constant 0.000000e+00 : f32
    %8 = vector.broadcast %cst_8 : f32 to vector<32x32xf32>
    %9 = arith.maximumf %7, %8 : vector<32x32xf32>
    %c0_9 = arith.constant 0 : index
    %c0_10 = arith.constant 0 : index
    %10 = vector.load %arg7[%c0_9, %c0_10] : memref<32x32xf32, #tpu.memory_space<vmem>>, vector<32x32xf32>
    %cst_11 = arith.constant dense<0.000000e+00> : vector<32x32xf32>
    %11 = tpu.matmul %9, %10, %cst_11 {dimension_numbers = #tpu.dot_dimension_numbers<[1], [0], [0], [1], [0, 0, 1, 1], [], []>} : vector<32x32xf32>, vector<32x32xf32>, vector<32x32xf32> -> vector<32x32xf32>
    %c0_12 = arith.constant 0 : index
    %c0_13 = arith.constant 0 : index
    %12 = vector.load %arg8[%c0_12, %c0_13] : memref<1x32xf32, #tpu.memory_space<vmem>>, vector<1x32xf32>
    %13 = vector.broadcast %12 : vector<1x32xf32> to vector<32x32xf32>
    %14 = arith.addf %11, %13 : vector<32x32xf32>
    %cst_14 = arith.constant dense<0.000000e+00> : vector<32x32xf32>
    %15 = tpu.matmul %1, %14, %cst_14 {dimension_numbers = #tpu.dot_dimension_numbers<[1], [0], [0], [1], [0, 0, 1, 1], [], []>} : vector<32x32xf32>, vector<32x32xf32>, vector<32x32xf32> -> vector<32x32xf32>
    %c0_15 = arith.constant 0 : index
    %c0_16 = arith.constant 0 : index
    %16 = vector.load %arg4[%c0_15, %c0_16] : memref<32x32xf32, #tpu.memory_space<vmem>>, vector<32x32xf32>
    %c0_17 = arith.constant 0 : index
    %c0_18 = arith.constant 0 : index
    %17 = vector.load %arg9[%c0_17, %c0_18] : memref<32x32xf32, #tpu.memory_space<vmem>>, vector<32x32xf32>
    %c0_19 = arith.constant 0 : index
    %c0_20 = arith.constant 0 : index
    %18 = vector.load %arg10[%c0_19, %c0_20] : memref<1x32xf32, #tpu.memory_space<vmem>>, vector<1x32xf32>
    %c0_21 = arith.constant 0 : index
    %c0_22 = arith.constant 0 : index
    %19 = vector.load %arg11[%c0_21, %c0_22] : memref<32x16xf32, #tpu.memory_space<vmem>>, vector<32x16xf32>
    %c0_23 = arith.constant 0 : index
    %c0_24 = arith.constant 0 : index
    %20 = vector.load %arg12[%c0_23, %c0_24] : memref<1x16xf32, #tpu.memory_space<vmem>>, vector<1x16xf32>
    %cst_25 = arith.constant dense<0.000000e+00> : vector<32x32xf32>
    %21 = tpu.matmul %0, %17, %cst_25 {dimension_numbers = #tpu.dot_dimension_numbers<[1], [0], [0], [1], [0, 0, 1, 1], [], []>} : vector<32x32xf32>, vector<32x32xf32>, vector<32x32xf32> -> vector<32x32xf32>
    %cst_26 = arith.constant dense<0.000000e+00> : vector<32x32xf32>
    %22 = tpu.matmul %16, %21, %cst_26 {dimension_numbers = #tpu.dot_dimension_numbers<[1], [0], [0], [1], [0, 0, 1, 1], [], []>} : vector<32x32xf32>, vector<32x32xf32>, vector<32x32xf32> -> vector<32x32xf32>
    %23 = vector.broadcast %18 : vector<1x32xf32> to vector<32x32xf32>
    %24 = arith.addf %22, %23 : vector<32x32xf32>
    %cst_27 = arith.constant 0.000000e+00 : f32
    %25 = vector.broadcast %cst_27 : f32 to vector<32x32xf32>
    %26 = arith.maximumf %24, %25 : vector<32x32xf32>
    %cst_28 = arith.constant dense<0.000000e+00> : vector<32x16xf32>
    %27 = tpu.matmul %26, %19, %cst_28 {dimension_numbers = #tpu.dot_dimension_numbers<[1], [0], [0], [1], [0, 0, 1, 1], [], []>} : vector<32x32xf32>, vector<32x16xf32>, vector<32x16xf32> -> vector<32x16xf32>
    %cst_29 = arith.constant dense<0.000000e+00> : vector<32x16xf32>
    %28 = tpu.matmul %16, %27, %cst_29 {dimension_numbers = #tpu.dot_dimension_numbers<[1], [0], [0], [1], [0, 0, 1, 1], [], []>} : vector<32x32xf32>, vector<32x16xf32>, vector<32x16xf32> -> vector<32x16xf32>
    %29 = vector.broadcast %20 : vector<1x16xf32> to vector<32x16xf32>
    %30 = arith.addf %28, %29 : vector<32x16xf32>
    %c0_30 = arith.constant 0 : index
    %c0_31 = arith.constant 0 : index
    %31 = vector.load %arg3[%c0_30, %c0_31] : memref<32x32xf32, #tpu.memory_space<vmem>>, vector<32x32xf32>
    %c0_32 = arith.constant 0 : index
    %c0_33 = arith.constant 0 : index
    %32 = vector.load %arg13[%c0_32, %c0_33] : memref<32x32xf32, #tpu.memory_space<vmem>>, vector<32x32xf32>
    %c0_34 = arith.constant 0 : index
    %c0_35 = arith.constant 0 : index
    %33 = vector.load %arg14[%c0_34, %c0_35] : memref<1x32xf32, #tpu.memory_space<vmem>>, vector<1x32xf32>
    %c0_36 = arith.constant 0 : index
    %c0_37 = arith.constant 0 : index
    %34 = vector.load %arg15[%c0_36, %c0_37] : memref<32x16xf32, #tpu.memory_space<vmem>>, vector<32x16xf32>
    %c0_38 = arith.constant 0 : index
    %c0_39 = arith.constant 0 : index
    %35 = vector.load %arg16[%c0_38, %c0_39] : memref<1x16xf32, #tpu.memory_space<vmem>>, vector<1x16xf32>
    %cst_40 = arith.constant dense<0.000000e+00> : vector<32x32xf32>
    %36 = tpu.matmul %0, %32, %cst_40 {dimension_numbers = #tpu.dot_dimension_numbers<[1], [0], [0], [1], [0, 0, 1, 1], [], []>} : vector<32x32xf32>, vector<32x32xf32>, vector<32x32xf32> -> vector<32x32xf32>
    %cst_41 = arith.constant dense<0.000000e+00> : vector<32x32xf32>
    %37 = tpu.matmul %31, %36, %cst_41 {dimension_numbers = #tpu.dot_dimension_numbers<[1], [0], [0], [1], [0, 0, 1, 1], [], []>} : vector<32x32xf32>, vector<32x32xf32>, vector<32x32xf32> -> vector<32x32xf32>
    %38 = vector.broadcast %33 : vector<1x32xf32> to vector<32x32xf32>
    %39 = arith.addf %37, %38 : vector<32x32xf32>
    %cst_42 = arith.constant 0.000000e+00 : f32
    %40 = vector.broadcast %cst_42 : f32 to vector<32x32xf32>
    %41 = arith.maximumf %39, %40 : vector<32x32xf32>
    %cst_43 = arith.constant dense<0.000000e+00> : vector<32x16xf32>
    %42 = tpu.matmul %41, %34, %cst_43 {dimension_numbers = #tpu.dot_dimension_numbers<[1], [0], [0], [1], [0, 0, 1, 1], [], []>} : vector<32x32xf32>, vector<32x16xf32>, vector<32x16xf32> -> vector<32x16xf32>
    %cst_44 = arith.constant dense<0.000000e+00> : vector<32x16xf32>
    %43 = tpu.matmul %31, %42, %cst_44 {dimension_numbers = #tpu.dot_dimension_numbers<[1], [0], [0], [1], [0, 0, 1, 1], [], []>} : vector<32x32xf32>, vector<32x16xf32>, vector<32x16xf32> -> vector<32x16xf32>
    %44 = vector.broadcast %35 : vector<1x16xf32> to vector<32x16xf32>
    %45 = arith.addf %43, %44 : vector<32x16xf32>
    %46 = tpu.concatenate %45, %30 in 1 : vector<32x16xf32>, vector<32x16xf32> -> vector<32x32xf32>
    %c0_45 = arith.constant 0 : index
    %c0_46 = arith.constant 0 : index
    %47 = vector.load %arg0[%c0_45, %c0_46] : memref<16x32xf32, #tpu.memory_space<vmem>>, vector<16x32xf32>
    %48 = tpu.concatenate %15, %46 in 1 : vector<32x32xf32>, vector<32x32xf32> -> vector<32x64xf32>
    %cst_47 = arith.constant dense<0.000000e+00> : vector<16x64xf32>
    %49 = tpu.matmul %47, %48, %cst_47 {dimension_numbers = #tpu.dot_dimension_numbers<[1], [0], [0], [1], [0, 0, 1, 1], [], []>} : vector<16x32xf32>, vector<32x64xf32>, vector<16x64xf32> -> vector<16x64xf32>
    %c0_48 = arith.constant 0 : index
    %c0_49 = arith.constant 0 : index
    %50 = vector.load %arg17[%c0_48, %c0_49] : memref<64x192xf32, #tpu.memory_space<vmem>>, vector<64x192xf32>
    %cst_50 = arith.constant dense<0.000000e+00> : vector<16x192xf32>
    %51 = tpu.matmul %49, %50, %cst_50 {dimension_numbers = #tpu.dot_dimension_numbers<[1], [0], [0], [1], [0, 0, 1, 1], [], []>} : vector<16x64xf32>, vector<64x192xf32>, vector<16x192xf32> -> vector<16x192xf32>
    %c0_51 = arith.constant 0 : index
    %c0_52 = arith.constant 0 : index
    %52 = vector.load %arg18[%c0_51, %c0_52] : memref<1x192xf32, #tpu.memory_space<vmem>>, vector<1x192xf32>
    %53 = vector.broadcast %52 : vector<1x192xf32> to vector<16x192xf32>
    %54 = arith.addf %51, %53 : vector<16x192xf32>
    %c0_53 = arith.constant 0 : index
    %c0_54 = arith.constant 0 : index
    %55 = vector.load %arg19[%c0_53, %c0_54] : memref<64x192xf32, #tpu.memory_space<vmem>>, vector<64x192xf32>
    %c0_55 = arith.constant 0 : index
    %c0_56 = arith.constant 0 : index
    %56 = vector.load %arg20[%c0_55, %c0_56] : memref<1x64xf32, #tpu.memory_space<vmem>>, vector<1x64xf32>
    %57 = vector.shape_cast %56 : vector<1x64xf32> to vector<1x64xf32>
    %58 = vector.broadcast %57 : vector<1x64xf32> to vector<2x64xf32>
    %cst_57 = arith.constant 0.000000e+00 : f32
    %59 = vector.broadcast %cst_57 : f32 to vector<2x64xf32>
    %cst_58 = arith.constant dense<0.000000e+00> : vector<2x192xf32>
    %60 = tpu.matmul %59, %55, %cst_58 {dimension_numbers = #tpu.dot_dimension_numbers<[1], [0], [0], [1], [0, 0, 1, 1], [], []>} : vector<2x64xf32>, vector<64x192xf32>, vector<2x192xf32> -> vector<2x192xf32>
    %61 = vector.extract_strided_slice %54 {offsets = [0, 0], sizes = [2, 192], strides = [1, 1]} : vector<16x192xf32> to vector<2x192xf32>
    %62 = vector.extract_strided_slice %61 {offsets = [0, 0], sizes = [2, 64], strides = [1, 1]} : vector<2x192xf32> to vector<2x64xf32>
    %63 = vector.extract_strided_slice %60 {offsets = [0, 0], sizes = [2, 64], strides = [1, 1]} : vector<2x192xf32> to vector<2x64xf32>
    %64 = arith.addf %62, %63 : vector<2x64xf32>
    %65 = arith.negf %64 : vector<2x64xf32>
    %66 = math.exp %65 : vector<2x64xf32>
    %cst_59 = arith.constant 1.000000e+00 : f32
    %67 = vector.broadcast %cst_59 : f32 to vector<2x64xf32>
    %68 = arith.addf %67, %66 : vector<2x64xf32>
    %69 = arith.divf %67, %68 : vector<2x64xf32>
    %70 = vector.extract_strided_slice %61 {offsets = [0, 64], sizes = [2, 64], strides = [1, 1]} : vector<2x192xf32> to vector<2x64xf32>
    %71 = vector.extract_strided_slice %60 {offsets = [0, 64], sizes = [2, 64], strides = [1, 1]} : vector<2x192xf32> to vector<2x64xf32>
    %72 = arith.addf %70, %71 : vector<2x64xf32>
    %73 = arith.negf %72 : vector<2x64xf32>
    %74 = math.exp %73 : vector<2x64xf32>
    %cst_60 = arith.constant 1.000000e+00 : f32
    %75 = vector.broadcast %cst_60 : f32 to vector<2x64xf32>
    %76 = arith.addf %75, %74 : vector<2x64xf32>
    %77 = arith.divf %75, %76 : vector<2x64xf32>
    %78 = vector.extract_strided_slice %61 {offsets = [0, 128], sizes = [2, 64], strides = [1, 1]} : vector<2x192xf32> to vector<2x64xf32>
    %79 = vector.extract_strided_slice %60 {offsets = [0, 128], sizes = [2, 64], strides = [1, 1]} : vector<2x192xf32> to vector<2x64xf32>
    %80 = arith.addf %79, %58 : vector<2x64xf32>
    %81 = arith.mulf %69, %80 : vector<2x64xf32>
    %82 = arith.addf %78, %81 : vector<2x64xf32>
    %83 = math.tanh %82 : vector<2x64xf32>
    %cst_61 = arith.constant 1.000000e+00 : f32
    %84 = vector.broadcast %cst_61 : f32 to vector<2x64xf32>
    %85 = arith.subf %84, %77 : vector<2x64xf32>
    %86 = arith.mulf %85, %83 : vector<2x64xf32>
    %87 = arith.mulf %77, %59 : vector<2x64xf32>
    %88 = arith.addf %86, %87 : vector<2x64xf32>
    %c0_62 = arith.constant 0 : index
    %c0_63 = arith.constant 0 : index
    %89 = vector.load %arg26[%c0_62, %c0_63] : memref<16x64xf32, #tpu.memory_space<vmem>>, vector<2x64xf32>
    tpu.vector_store %arg26[%c0_62, %c0_63], %88 {strides = array<i32>} : memref<16x64xf32, #tpu.memory_space<vmem>>, vector<2x64xf32>,
    %cst_64 = arith.constant dense<0.000000e+00> : vector<2x192xf32>
    %90 = tpu.matmul %88, %55, %cst_64 {dimension_numbers = #tpu.dot_dimension_numbers<[1], [0], [0], [1], [0, 0, 1, 1], [], []>} : vector<2x64xf32>, vector<64x192xf32>, vector<2x192xf32> -> vector<2x192xf32>
    %91 = vector.extract_strided_slice %54 {offsets = [2, 0], sizes = [2, 192], strides = [1, 1]} : vector<16x192xf32> to vector<2x192xf32>
    %92 = vector.extract_strided_slice %91 {offsets = [0, 0], sizes = [2, 64], strides = [1, 1]} : vector<2x192xf32> to vector<2x64xf32>
    %93 = vector.extract_strided_slice %90 {offsets = [0, 0], sizes = [2, 64], strides = [1, 1]} : vector<2x192xf32> to vector<2x64xf32>
    %94 = arith.addf %92, %93 : vector<2x64xf32>
    %95 = arith.negf %94 : vector<2x64xf32>
    %96 = math.exp %95 : vector<2x64xf32>
    %cst_65 = arith.constant 1.000000e+00 : f32
    %97 = vector.broadcast %cst_65 : f32 to vector<2x64xf32>
    %98 = arith.addf %97, %96 : vector<2x64xf32>
    %99 = arith.divf %97, %98 : vector<2x64xf32>
    %100 = vector.extract_strided_slice %91 {offsets = [0, 64], sizes = [2, 64], strides = [1, 1]} : vector<2x192xf32> to vector<2x64xf32>
    %101 = vector.extract_strided_slice %90 {offsets = [0, 64], sizes = [2, 64], strides = [1, 1]} : vector<2x192xf32> to vector<2x64xf32>
    %102 = arith.addf %100, %101 : vector<2x64xf32>
    %103 = arith.negf %102 : vector<2x64xf32>
    %104 = math.exp %103 : vector<2x64xf32>
    %cst_66 = arith.constant 1.000000e+00 : f32
    %105 = vector.broadcast %cst_66 : f32 to vector<2x64xf32>
    %106 = arith.addf %105, %104 : vector<2x64xf32>
    %107 = arith.divf %105, %106 : vector<2x64xf32>
    %108 = vector.extract_strided_slice %91 {offsets = [0, 128], sizes = [2, 64], strides = [1, 1]} : vector<2x192xf32> to vector<2x64xf32>
    %109 = vector.extract_strided_slice %90 {offsets = [0, 128], sizes = [2, 64], strides = [1, 1]} : vector<2x192xf32> to vector<2x64xf32>
    %110 = arith.addf %109, %58 : vector<2x64xf32>
    %111 = arith.mulf %99, %110 : vector<2x64xf32>
    %112 = arith.addf %108, %111 : vector<2x64xf32>
    %113 = math.tanh %112 : vector<2x64xf32>
    %cst_67 = arith.constant 1.000000e+00 : f32
    %114 = vector.broadcast %cst_67 : f32 to vector<2x64xf32>
    %115 = arith.subf %114, %107 : vector<2x64xf32>
    %116 = arith.mulf %115, %113 : vector<2x64xf32>
    %117 = arith.mulf %107, %88 : vector<2x64xf32>
    %118 = arith.addf %116, %117 : vector<2x64xf32>
    %c2 = arith.constant 2 : index
    %c0_68 = arith.constant 0 : index
    %119 = vector.load %arg26[%c2, %c0_68] : memref<16x64xf32, #tpu.memory_space<vmem>>, vector<2x64xf32>
    tpu.vector_store %arg26[%c2, %c0_68], %118 {strides = array<i32>} : memref<16x64xf32, #tpu.memory_space<vmem>>, vector<2x64xf32>,
    %cst_69 = arith.constant dense<0.000000e+00> : vector<2x192xf32>
    %120 = tpu.matmul %118, %55, %cst_69 {dimension_numbers = #tpu.dot_dimension_numbers<[1], [0], [0], [1], [0, 0, 1, 1], [], []>} : vector<2x64xf32>, vector<64x192xf32>, vector<2x192xf32> -> vector<2x192xf32>
    %121 = vector.extract_strided_slice %54 {offsets = [4, 0], sizes = [2, 192], strides = [1, 1]} : vector<16x192xf32> to vector<2x192xf32>
    %122 = vector.extract_strided_slice %121 {offsets = [0, 0], sizes = [2, 64], strides = [1, 1]} : vector<2x192xf32> to vector<2x64xf32>
    %123 = vector.extract_strided_slice %120 {offsets = [0, 0], sizes = [2, 64], strides = [1, 1]} : vector<2x192xf32> to vector<2x64xf32>
    %124 = arith.addf %122, %123 : vector<2x64xf32>
    %125 = arith.negf %124 : vector<2x64xf32>
    %126 = math.exp %125 : vector<2x64xf32>
    %cst_70 = arith.constant 1.000000e+00 : f32
    %127 = vector.broadcast %cst_70 : f32 to vector<2x64xf32>
    %128 = arith.addf %127, %126 : vector<2x64xf32>
    %129 = arith.divf %127, %128 : vector<2x64xf32>
    %130 = vector.extract_strided_slice %121 {offsets = [0, 64], sizes = [2, 64], strides = [1, 1]} : vector<2x192xf32> to vector<2x64xf32>
    %131 = vector.extract_strided_slice %120 {offsets = [0, 64], sizes = [2, 64], strides = [1, 1]} : vector<2x192xf32> to vector<2x64xf32>
    %132 = arith.addf %130, %131 : vector<2x64xf32>
    %133 = arith.negf %132 : vector<2x64xf32>
    %134 = math.exp %133 : vector<2x64xf32>
    %cst_71 = arith.constant 1.000000e+00 : f32
    %135 = vector.broadcast %cst_71 : f32 to vector<2x64xf32>
    %136 = arith.addf %135, %134 : vector<2x64xf32>
    %137 = arith.divf %135, %136 : vector<2x64xf32>
    %138 = vector.extract_strided_slice %121 {offsets = [0, 128], sizes = [2, 64], strides = [1, 1]} : vector<2x192xf32> to vector<2x64xf32>
    %139 = vector.extract_strided_slice %120 {offsets = [0, 128], sizes = [2, 64], strides = [1, 1]} : vector<2x192xf32> to vector<2x64xf32>
    %140 = arith.addf %139, %58 : vector<2x64xf32>
    %141 = arith.mulf %129, %140 : vector<2x64xf32>
    %142 = arith.addf %138, %141 : vector<2x64xf32>
    %143 = math.tanh %142 : vector<2x64xf32>
    %cst_72 = arith.constant 1.000000e+00 : f32
    %144 = vector.broadcast %cst_72 : f32 to vector<2x64xf32>
    %145 = arith.subf %144, %137 : vector<2x64xf32>
    %146 = arith.mulf %145, %143 : vector<2x64xf32>
    %147 = arith.mulf %137, %118 : vector<2x64xf32>
    %148 = arith.addf %146, %147 : vector<2x64xf32>
    %c4 = arith.constant 4 : index
    %c0_73 = arith.constant 0 : index
    %149 = vector.load %arg26[%c4, %c0_73] : memref<16x64xf32, #tpu.memory_space<vmem>>, vector<2x64xf32>
    tpu.vector_store %arg26[%c4, %c0_73], %148 {strides = array<i32>} : memref<16x64xf32, #tpu.memory_space<vmem>>, vector<2x64xf32>,
    %cst_74 = arith.constant dense<0.000000e+00> : vector<2x192xf32>
    %150 = tpu.matmul %148, %55, %cst_74 {dimension_numbers = #tpu.dot_dimension_numbers<[1], [0], [0], [1], [0, 0, 1, 1], [], []>} : vector<2x64xf32>, vector<64x192xf32>, vector<2x192xf32> -> vector<2x192xf32>
    %151 = vector.extract_strided_slice %54 {offsets = [6, 0], sizes = [2, 192], strides = [1, 1]} : vector<16x192xf32> to vector<2x192xf32>
    %152 = vector.extract_strided_slice %151 {offsets = [0, 0], sizes = [2, 64], strides = [1, 1]} : vector<2x192xf32> to vector<2x64xf32>
    %153 = vector.extract_strided_slice %150 {offsets = [0, 0], sizes = [2, 64], strides = [1, 1]} : vector<2x192xf32> to vector<2x64xf32>
    %154 = arith.addf %152, %153 : vector<2x64xf32>
    %155 = arith.negf %154 : vector<2x64xf32>
    %156 = math.exp %155 : vector<2x64xf32>
    %cst_75 = arith.constant 1.000000e+00 : f32
    %157 = vector.broadcast %cst_75 : f32 to vector<2x64xf32>
    %158 = arith.addf %157, %156 : vector<2x64xf32>
    %159 = arith.divf %157, %158 : vector<2x64xf32>
    %160 = vector.extract_strided_slice %151 {offsets = [0, 64], sizes = [2, 64], strides = [1, 1]} : vector<2x192xf32> to vector<2x64xf32>
    %161 = vector.extract_strided_slice %150 {offsets = [0, 64], sizes = [2, 64], strides = [1, 1]} : vector<2x192xf32> to vector<2x64xf32>
    %162 = arith.addf %160, %161 : vector<2x64xf32>
    %163 = arith.negf %162 : vector<2x64xf32>
    %164 = math.exp %163 : vector<2x64xf32>
    %cst_76 = arith.constant 1.000000e+00 : f32
    %165 = vector.broadcast %cst_76 : f32 to vector<2x64xf32>
    %166 = arith.addf %165, %164 : vector<2x64xf32>
    %167 = arith.divf %165, %166 : vector<2x64xf32>
    %168 = vector.extract_strided_slice %151 {offsets = [0, 128], sizes = [2, 64], strides = [1, 1]} : vector<2x192xf32> to vector<2x64xf32>
    %169 = vector.extract_strided_slice %150 {offsets = [0, 128], sizes = [2, 64], strides = [1, 1]} : vector<2x192xf32> to vector<2x64xf32>
    %170 = arith.addf %169, %58 : vector<2x64xf32>
    %171 = arith.mulf %159, %170 : vector<2x64xf32>
    %172 = arith.addf %168, %171 : vector<2x64xf32>
    %173 = math.tanh %172 : vector<2x64xf32>
    %cst_77 = arith.constant 1.000000e+00 : f32
    %174 = vector.broadcast %cst_77 : f32 to vector<2x64xf32>
    %175 = arith.subf %174, %167 : vector<2x64xf32>
    %176 = arith.mulf %175, %173 : vector<2x64xf32>
    %177 = arith.mulf %167, %148 : vector<2x64xf32>
    %178 = arith.addf %176, %177 : vector<2x64xf32>
    %c6 = arith.constant 6 : index
    %c0_78 = arith.constant 0 : index
    %179 = vector.load %arg26[%c6, %c0_78] : memref<16x64xf32, #tpu.memory_space<vmem>>, vector<2x64xf32>
    tpu.vector_store %arg26[%c6, %c0_78], %178 {strides = array<i32>} : memref<16x64xf32, #tpu.memory_space<vmem>>, vector<2x64xf32>,
    %cst_79 = arith.constant dense<0.000000e+00> : vector<2x192xf32>
    %180 = tpu.matmul %178, %55, %cst_79 {dimension_numbers = #tpu.dot_dimension_numbers<[1], [0], [0], [1], [0, 0, 1, 1], [], []>} : vector<2x64xf32>, vector<64x192xf32>, vector<2x192xf32> -> vector<2x192xf32>
    %181 = vector.extract_strided_slice %54 {offsets = [8, 0], sizes = [2, 192], strides = [1, 1]} : vector<16x192xf32> to vector<2x192xf32>
    %182 = vector.extract_strided_slice %181 {offsets = [0, 0], sizes = [2, 64], strides = [1, 1]} : vector<2x192xf32> to vector<2x64xf32>
    %183 = vector.extract_strided_slice %180 {offsets = [0, 0], sizes = [2, 64], strides = [1, 1]} : vector<2x192xf32> to vector<2x64xf32>
    %184 = arith.addf %182, %183 : vector<2x64xf32>
    %185 = arith.negf %184 : vector<2x64xf32>
    %186 = math.exp %185 : vector<2x64xf32>
    %cst_80 = arith.constant 1.000000e+00 : f32
    %187 = vector.broadcast %cst_80 : f32 to vector<2x64xf32>
    %188 = arith.addf %187, %186 : vector<2x64xf32>
    %189 = arith.divf %187, %188 : vector<2x64xf32>
    %190 = vector.extract_strided_slice %181 {offsets = [0, 64], sizes = [2, 64], strides = [1, 1]} : vector<2x192xf32> to vector<2x64xf32>
    %191 = vector.extract_strided_slice %180 {offsets = [0, 64], sizes = [2, 64], strides = [1, 1]} : vector<2x192xf32> to vector<2x64xf32>
    %192 = arith.addf %190, %191 : vector<2x64xf32>
    %193 = arith.negf %192 : vector<2x64xf32>
    %194 = math.exp %193 : vector<2x64xf32>
    %cst_81 = arith.constant 1.000000e+00 : f32
    %195 = vector.broadcast %cst_81 : f32 to vector<2x64xf32>
    %196 = arith.addf %195, %194 : vector<2x64xf32>
    %197 = arith.divf %195, %196 : vector<2x64xf32>
    %198 = vector.extract_strided_slice %181 {offsets = [0, 128], sizes = [2, 64], strides = [1, 1]} : vector<2x192xf32> to vector<2x64xf32>
    %199 = vector.extract_strided_slice %180 {offsets = [0, 128], sizes = [2, 64], strides = [1, 1]} : vector<2x192xf32> to vector<2x64xf32>
    %200 = arith.addf %199, %58 : vector<2x64xf32>
    %201 = arith.mulf %189, %200 : vector<2x64xf32>
    %202 = arith.addf %198, %201 : vector<2x64xf32>
    %203 = math.tanh %202 : vector<2x64xf32>
    %cst_82 = arith.constant 1.000000e+00 : f32
    %204 = vector.broadcast %cst_82 : f32 to vector<2x64xf32>
    %205 = arith.subf %204, %197 : vector<2x64xf32>
    %206 = arith.mulf %205, %203 : vector<2x64xf32>
    %207 = arith.mulf %197, %178 : vector<2x64xf32>
    %208 = arith.addf %206, %207 : vector<2x64xf32>
    %c8 = arith.constant 8 : index
    %c0_83 = arith.constant 0 : index
    %209 = vector.load %arg26[%c8, %c0_83] : memref<16x64xf32, #tpu.memory_space<vmem>>, vector<2x64xf32>
    tpu.vector_store %arg26[%c8, %c0_83], %208 {strides = array<i32>} : memref<16x64xf32, #tpu.memory_space<vmem>>, vector<2x64xf32>,
    %cst_84 = arith.constant dense<0.000000e+00> : vector<2x192xf32>
    %210 = tpu.matmul %208, %55, %cst_84 {dimension_numbers = #tpu.dot_dimension_numbers<[1], [0], [0], [1], [0, 0, 1, 1], [], []>} : vector<2x64xf32>, vector<64x192xf32>, vector<2x192xf32> -> vector<2x192xf32>
    %211 = vector.extract_strided_slice %54 {offsets = [10, 0], sizes = [2, 192], strides = [1, 1]} : vector<16x192xf32> to vector<2x192xf32>
    %212 = vector.extract_strided_slice %211 {offsets = [0, 0], sizes = [2, 64], strides = [1, 1]} : vector<2x192xf32> to vector<2x64xf32>
    %213 = vector.extract_strided_slice %210 {offsets = [0, 0], sizes = [2, 64], strides = [1, 1]} : vector<2x192xf32> to vector<2x64xf32>
    %214 = arith.addf %212, %213 : vector<2x64xf32>
    %215 = arith.negf %214 : vector<2x64xf32>
    %216 = math.exp %215 : vector<2x64xf32>
    %cst_85 = arith.constant 1.000000e+00 : f32
    %217 = vector.broadcast %cst_85 : f32 to vector<2x64xf32>
    %218 = arith.addf %217, %216 : vector<2x64xf32>
    %219 = arith.divf %217, %218 : vector<2x64xf32>
    %220 = vector.extract_strided_slice %211 {offsets = [0, 64], sizes = [2, 64], strides = [1, 1]} : vector<2x192xf32> to vector<2x64xf32>
    %221 = vector.extract_strided_slice %210 {offsets = [0, 64], sizes = [2, 64], strides = [1, 1]} : vector<2x192xf32> to vector<2x64xf32>
    %222 = arith.addf %220, %221 : vector<2x64xf32>
    %223 = arith.negf %222 : vector<2x64xf32>
    %224 = math.exp %223 : vector<2x64xf32>
    %cst_86 = arith.constant 1.000000e+00 : f32
    %225 = vector.broadcast %cst_86 : f32 to vector<2x64xf32>
    %226 = arith.addf %225, %224 : vector<2x64xf32>
    %227 = arith.divf %225, %226 : vector<2x64xf32>
    %228 = vector.extract_strided_slice %211 {offsets = [0, 128], sizes = [2, 64], strides = [1, 1]} : vector<2x192xf32> to vector<2x64xf32>
    %229 = vector.extract_strided_slice %210 {offsets = [0, 128], sizes = [2, 64], strides = [1, 1]} : vector<2x192xf32> to vector<2x64xf32>
    %230 = arith.addf %229, %58 : vector<2x64xf32>
    %231 = arith.mulf %219, %230 : vector<2x64xf32>
    %232 = arith.addf %228, %231 : vector<2x64xf32>
    %233 = math.tanh %232 : vector<2x64xf32>
    %cst_87 = arith.constant 1.000000e+00 : f32
    %234 = vector.broadcast %cst_87 : f32 to vector<2x64xf32>
    %235 = arith.subf %234, %227 : vector<2x64xf32>
    %236 = arith.mulf %235, %233 : vector<2x64xf32>
    %237 = arith.mulf %227, %208 : vector<2x64xf32>
    %238 = arith.addf %236, %237 : vector<2x64xf32>
    %c10 = arith.constant 10 : index
    %c0_88 = arith.constant 0 : index
    %239 = vector.load %arg26[%c10, %c0_88] : memref<16x64xf32, #tpu.memory_space<vmem>>, vector<2x64xf32>
    tpu.vector_store %arg26[%c10, %c0_88], %238 {strides = array<i32>} : memref<16x64xf32, #tpu.memory_space<vmem>>, vector<2x64xf32>,
    %cst_89 = arith.constant dense<0.000000e+00> : vector<2x192xf32>
    %240 = tpu.matmul %238, %55, %cst_89 {dimension_numbers = #tpu.dot_dimension_numbers<[1], [0], [0], [1], [0, 0, 1, 1], [], []>} : vector<2x64xf32>, vector<64x192xf32>, vector<2x192xf32> -> vector<2x192xf32>
    %241 = vector.extract_strided_slice %54 {offsets = [12, 0], sizes = [2, 192], strides = [1, 1]} : vector<16x192xf32> to vector<2x192xf32>
    %242 = vector.extract_strided_slice %241 {offsets = [0, 0], sizes = [2, 64], strides = [1, 1]} : vector<2x192xf32> to vector<2x64xf32>
    %243 = vector.extract_strided_slice %240 {offsets = [0, 0], sizes = [2, 64], strides = [1, 1]} : vector<2x192xf32> to vector<2x64xf32>
    %244 = arith.addf %242, %243 : vector<2x64xf32>
    %245 = arith.negf %244 : vector<2x64xf32>
    %246 = math.exp %245 : vector<2x64xf32>
    %cst_90 = arith.constant 1.000000e+00 : f32
    %247 = vector.broadcast %cst_90 : f32 to vector<2x64xf32>
    %248 = arith.addf %247, %246 : vector<2x64xf32>
    %249 = arith.divf %247, %248 : vector<2x64xf32>
    %250 = vector.extract_strided_slice %241 {offsets = [0, 64], sizes = [2, 64], strides = [1, 1]} : vector<2x192xf32> to vector<2x64xf32>
    %251 = vector.extract_strided_slice %240 {offsets = [0, 64], sizes = [2, 64], strides = [1, 1]} : vector<2x192xf32> to vector<2x64xf32>
    %252 = arith.addf %250, %251 : vector<2x64xf32>
    %253 = arith.negf %252 : vector<2x64xf32>
    %254 = math.exp %253 : vector<2x64xf32>
    %cst_91 = arith.constant 1.000000e+00 : f32
    %255 = vector.broadcast %cst_91 : f32 to vector<2x64xf32>
    %256 = arith.addf %255, %254 : vector<2x64xf32>
    %257 = arith.divf %255, %256 : vector<2x64xf32>
    %258 = vector.extract_strided_slice %241 {offsets = [0, 128], sizes = [2, 64], strides = [1, 1]} : vector<2x192xf32> to vector<2x64xf32>
    %259 = vector.extract_strided_slice %240 {offsets = [0, 128], sizes = [2, 64], strides = [1, 1]} : vector<2x192xf32> to vector<2x64xf32>
    %260 = arith.addf %259, %58 : vector<2x64xf32>
    %261 = arith.mulf %249, %260 : vector<2x64xf32>
    %262 = arith.addf %258, %261 : vector<2x64xf32>
    %263 = math.tanh %262 : vector<2x64xf32>
    %cst_92 = arith.constant 1.000000e+00 : f32
    %264 = vector.broadcast %cst_92 : f32 to vector<2x64xf32>
    %265 = arith.subf %264, %257 : vector<2x64xf32>
    %266 = arith.mulf %265, %263 : vector<2x64xf32>
    %267 = arith.mulf %257, %238 : vector<2x64xf32>
    %268 = arith.addf %266, %267 : vector<2x64xf32>
    %c12 = arith.constant 12 : index
    %c0_93 = arith.constant 0 : index
    %269 = vector.load %arg26[%c12, %c0_93] : memref<16x64xf32, #tpu.memory_space<vmem>>, vector<2x64xf32>
    tpu.vector_store %arg26[%c12, %c0_93], %268 {strides = array<i32>} : memref<16x64xf32, #tpu.memory_space<vmem>>, vector<2x64xf32>,
    %cst_94 = arith.constant dense<0.000000e+00> : vector<2x192xf32>
    %270 = tpu.matmul %268, %55, %cst_94 {dimension_numbers = #tpu.dot_dimension_numbers<[1], [0], [0], [1], [0, 0, 1, 1], [], []>} : vector<2x64xf32>, vector<64x192xf32>, vector<2x192xf32> -> vector<2x192xf32>
    %271 = vector.extract_strided_slice %54 {offsets = [14, 0], sizes = [2, 192], strides = [1, 1]} : vector<16x192xf32> to vector<2x192xf32>
    %272 = vector.extract_strided_slice %271 {offsets = [0, 0], sizes = [2, 64], strides = [1, 1]} : vector<2x192xf32> to vector<2x64xf32>
    %273 = vector.extract_strided_slice %270 {offsets = [0, 0], sizes = [2, 64], strides = [1, 1]} : vector<2x192xf32> to vector<2x64xf32>
    %274 = arith.addf %272, %273 : vector<2x64xf32>
    %275 = arith.negf %274 : vector<2x64xf32>
    %276 = math.exp %275 : vector<2x64xf32>
    %cst_95 = arith.constant 1.000000e+00 : f32
    %277 = vector.broadcast %cst_95 : f32 to vector<2x64xf32>
    %278 = arith.addf %277, %276 : vector<2x64xf32>
    %279 = arith.divf %277, %278 : vector<2x64xf32>
    %280 = vector.extract_strided_slice %271 {offsets = [0, 64], sizes = [2, 64], strides = [1, 1]} : vector<2x192xf32> to vector<2x64xf32>
    %281 = vector.extract_strided_slice %270 {offsets = [0, 64], sizes = [2, 64], strides = [1, 1]} : vector<2x192xf32> to vector<2x64xf32>
    %282 = arith.addf %280, %281 : vector<2x64xf32>
    %283 = arith.negf %282 : vector<2x64xf32>
    %284 = math.exp %283 : vector<2x64xf32>
    %cst_96 = arith.constant 1.000000e+00 : f32
    %285 = vector.broadcast %cst_96 : f32 to vector<2x64xf32>
    %286 = arith.addf %285, %284 : vector<2x64xf32>
    %287 = arith.divf %285, %286 : vector<2x64xf32>
    %288 = vector.extract_strided_slice %271 {offsets = [0, 128], sizes = [2, 64], strides = [1, 1]} : vector<2x192xf32> to vector<2x64xf32>
    %289 = vector.extract_strided_slice %270 {offsets = [0, 128], sizes = [2, 64], strides = [1, 1]} : vector<2x192xf32> to vector<2x64xf32>
    %290 = arith.addf %289, %58 : vector<2x64xf32>
    %291 = arith.mulf %279, %290 : vector<2x64xf32>
    %292 = arith.addf %288, %291 : vector<2x64xf32>
    %293 = math.tanh %292 : vector<2x64xf32>
    %cst_97 = arith.constant 1.000000e+00 : f32
    %294 = vector.broadcast %cst_97 : f32 to vector<2x64xf32>
    %295 = arith.subf %294, %287 : vector<2x64xf32>
    %296 = arith.mulf %295, %293 : vector<2x64xf32>
    %297 = arith.mulf %287, %268 : vector<2x64xf32>
    %298 = arith.addf %296, %297 : vector<2x64xf32>
    %c14 = arith.constant 14 : index
    %c0_98 = arith.constant 0 : index
    %299 = vector.load %arg26[%c14, %c0_98] : memref<16x64xf32, #tpu.memory_space<vmem>>, vector<2x64xf32>
    tpu.vector_store %arg26[%c14, %c0_98], %298 {strides = array<i32>} : memref<16x64xf32, #tpu.memory_space<vmem>>, vector<2x64xf32>,
    %c0_99 = arith.constant 0 : index
    %c0_100 = arith.constant 0 : index
    %300 = vector.load %arg26[%c0_99, %c0_100] : memref<16x64xf32, #tpu.memory_space<vmem>>, vector<16x64xf32>
    %301 = vector.extract_strided_slice %300 {offsets = [0, 0], sizes = [16, 32], strides = [1, 1]} : vector<16x64xf32> to vector<16x32xf32>
    %302 = vector.extract_strided_slice %300 {offsets = [0, 32], sizes = [16, 32], strides = [1, 1]} : vector<16x64xf32> to vector<16x32xf32>
    %c0_101 = arith.constant 0 : index
    %c0_102 = arith.constant 0 : index
    %303 = vector.load %arg21[%c0_101, %c0_102] : memref<64x64xf32, #tpu.memory_space<vmem>>, vector<64x64xf32>
    %cst_103 = arith.constant dense<0.000000e+00> : vector<16x64xf32>
    %304 = tpu.matmul %300, %303, %cst_103 {dimension_numbers = #tpu.dot_dimension_numbers<[1], [0], [0], [1], [0, 0, 1, 1], [], []>} : vector<16x64xf32>, vector<64x64xf32>, vector<16x64xf32> -> vector<16x64xf32>
    %c0_104 = arith.constant 0 : index
    %c0_105 = arith.constant 0 : index
    %305 = vector.load %arg22[%c0_104, %c0_105] : memref<1x64xf32, #tpu.memory_space<vmem>>, vector<1x64xf32>
    %306 = vector.broadcast %305 : vector<1x64xf32> to vector<16x64xf32>
    %307 = arith.addf %304, %306 : vector<16x64xf32>
    %308 = vector.extract_strided_slice %307 {offsets = [0, 32], sizes = [16, 32], strides = [1, 1]} : vector<16x64xf32> to vector<16x32xf32>
    %309 = arith.negf %308 : vector<16x32xf32>
    %310 = math.exp %309 : vector<16x32xf32>
    %cst_106 = arith.constant 1.000000e+00 : f32
    %311 = vector.broadcast %cst_106 : f32 to vector<16x32xf32>
    %312 = arith.addf %311, %310 : vector<16x32xf32>
    %313 = arith.divf %311, %312 : vector<16x32xf32>
    %314 = arith.mulf %313, %302 : vector<16x32xf32>
    %cst_107 = arith.constant 1.000000e+00 : f32
    %315 = vector.broadcast %cst_107 : f32 to vector<16x32xf32>
    %316 = arith.subf %315, %313 : vector<16x32xf32>
    %317 = arith.mulf %316, %301 : vector<16x32xf32>
    %318 = tpu.concatenate %314, %317 in 1 : vector<16x32xf32>, vector<16x32xf32> -> vector<16x64xf32>
    %c0_108 = arith.constant 0 : index
    %c0_109 = arith.constant 0 : index
    %319 = vector.load %arg23[%c0_108, %c0_109] : memref<64x16xf32, #tpu.memory_space<vmem>>, vector<64x16xf32>
    %cst_110 = arith.constant dense<0.000000e+00> : vector<16x16xf32>
    %320 = tpu.matmul %318, %319, %cst_110 {dimension_numbers = #tpu.dot_dimension_numbers<[1], [0], [0], [1], [0, 0, 1, 1], [], []>} : vector<16x64xf32>, vector<64x16xf32>, vector<16x16xf32> -> vector<16x16xf32>
    %c0_111 = arith.constant 0 : index
    %c0_112 = arith.constant 0 : index
    %321 = vector.load %arg24[%c0_111, %c0_112] : memref<1x16xf32, #tpu.memory_space<vmem>>, vector<1x16xf32>
    %322 = vector.broadcast %321 : vector<1x16xf32> to vector<16x16xf32>
    %323 = arith.addf %320, %322 : vector<16x16xf32>
    %324 = vector.extract_strided_slice %307 {offsets = [0, 0], sizes = [16, 16], strides = [1, 1]} : vector<16x64xf32> to vector<16x16xf32>
    %c0_113 = arith.constant 0 : index
    %c0_114 = arith.constant 0 : index
    %c0_115 = arith.constant 0 : index
    %325 = vector.load %arg25[%c0_113, %c0_114, %c0_115] : memref<3x16x16xf32, #tpu.memory_space<vmem>>, vector<1x16x16xf32>
    %326 = vector.shape_cast %325 : vector<1x16x16xf32> to vector<16x16xf32>
    %327 = vector.shape_cast %324 : vector<16x16xf32> to vector<1x16x16xf32>
    tpu.vector_store %arg25[%c0_113, %c0_114, %c0_115], %327 {strides = array<i32>} : memref<3x16x16xf32, #tpu.memory_space<vmem>>, vector<1x16x16xf32>,
    %328 = vector.extract_strided_slice %307 {offsets = [0, 16], sizes = [16, 16], strides = [1, 1]} : vector<16x64xf32> to vector<16x16xf32>
    %c1 = arith.constant 1 : index
    %c0_116 = arith.constant 0 : index
    %c0_117 = arith.constant 0 : index
    %329 = vector.load %arg25[%c1, %c0_116, %c0_117] : memref<3x16x16xf32, #tpu.memory_space<vmem>>, vector<1x16x16xf32>
    %330 = vector.shape_cast %329 : vector<1x16x16xf32> to vector<16x16xf32>
    %331 = vector.shape_cast %328 : vector<16x16xf32> to vector<1x16x16xf32>
    tpu.vector_store %arg25[%c1, %c0_116, %c0_117], %331 {strides = array<i32>} : memref<3x16x16xf32, #tpu.memory_space<vmem>>, vector<1x16x16xf32>,
    %c2_118 = arith.constant 2 : index
    %c0_119 = arith.constant 0 : index
    %c0_120 = arith.constant 0 : index
    %332 = vector.load %arg25[%c2_118, %c0_119, %c0_120] : memref<3x16x16xf32, #tpu.memory_space<vmem>>, vector<1x16x16xf32>
    %333 = vector.shape_cast %332 : vector<1x16x16xf32> to vector<16x16xf32>
    %334 = vector.shape_cast %323 : vector<16x16xf32> to vector<1x16x16xf32>
    tpu.vector_store %arg25[%c2_118, %c0_119, %c0_120], %334 {strides = array<i32>} : memref<3x16x16xf32, #tpu.memory_space<vmem>>, vector<1x16x16xf32>,
    return
  }
}

</mosaic_0001>

<bundles_post_ra>
// kernel: dkt_forward.1
= control target key start
LH: loop header
LB: loop body
LE: loop exit
PB: predicated region body
PF: predicated region fallthrough
CT: control target
= control target key end

     0   :  { %vm99_vm0 = vcmask 261120   ;;  %vm1295_vm1 = vcmask 130048   ;;  %vm1431_vm2 = vcmask 523264   ;;  %vm1635_vm3 = vcmask 517120   ;;  %s3985_s5 = inlined_call_operand.vmem [shape: f32[32,32], index: 5, kind: input, shape index: {}]   ;;  %s3986_s1 = inlined_call_operand.vmem [shape: f32[32,32], index: 1, kind: input, shape index: {}]   ;;  %s3987_s2 = inlined_call_operand.vmem [shape: f32[32,32], index: 2, kind: input, shape index: {}]   ;;  %s3988_s7 = inlined_call_operand.vmem [shape: f32[32,32], index: 7, kind: input, shape index: {}]   ;;  %s3989_s6 = inlined_call_operand.vmem [shape: f32[1,32], index: 6, kind: input, shape index: {}]   ;;  %s3990_s9 = inlined_call_operand.vmem [shape: f32[32,32], index: 9, kind: input, shape index: {}]   ;;  %s3991_s8 = inlined_call_operand.vmem [shape: f32[1,32], index: 8, kind: input, shape index: {}]   ;;  %s3992_s4 = inlined_call_operand.vmem [shape: f32[32,32], index: 4, kind: input, shape index: {}]   ;;  %s3993_s11 = inlined_call_operand.vmem [shape: f32[32,16], index: 11, kind: input, shape index: {}]   ;;  %s3994_s13 = inlined_call_operand.vmem [shape: f32[32,32], index: 13, kind: input, shape index: {}]   ;;  %s3995_s10 = inlined_call_operand.vmem [shape: f32[1,32], index: 10, kind: input, shape index: {}]   ;;  %s3996_s3 = inlined_call_operand.vmem [shape: f32[32,32], index: 3, kind: input, shape index: {}]   ;;  %s3997_s15 = inlined_call_operand.vmem [shape: f32[32,16], index: 15, kind: input, shape index: {}]   ;;  %s3998_s12 = inlined_call_operand.vmem [shape: f32[1,16], index: 12, kind: input, shape index: {}]   ;;  %s3999_s14 = inlined_call_operand.vmem [shape: f32[1,32], index: 14, kind: input, shape index: {}]   ;;  %s4000_s16 = inlined_call_operand.vmem [shape: f32[1,16], index: 16, kind: input, shape index: {}]   ;;  %s4001_s0 = inlined_call_operand.vmem [shape: f32[16,32], index: 0, kind: input, shape index: {}]   ;;  %s4002_s17 = inlined_call_operand.vmem [shape: f32[64,192], index: 17, kind: input, shape index: {}]   ;;  %s4003_s19 = inlined_call_operand.vmem [shape: f32[64,192], index: 19, kind: input, shape index: {}]   ;;  %s4004_s18 = inlined_call_operand.vmem [shape: f32[1,192], index: 18, kind: input, shape index: {}]   ;;  %s4005_s20 = inlined_call_operand.vmem [shape: f32[1,64], index: 20, kind: input, shape index: {}]   ;;  %s4006_s21 = inlined_call_operand.vmem [shape: f32[64,64], index: 21, kind: input, shape index: {}]   ;;  %s4007_s23 = inlined_call_operand.vmem [shape: f32[64,16], index: 23, kind: input, shape index: {}]   ;;  %s4008_s22 = inlined_call_operand.vmem [shape: f32[1,64], index: 22, kind: input, shape index: {}]   ;;  %s4009_s25 = inlined_call_operand.vmem [shape: f32[3,16,16], index: 25, kind: output, shape index: {}]   ;;  %s4010_s24 = inlined_call_operand.vmem [shape: f32[1,16], index: 24, kind: input, shape index: {}]  }
   0x1   :  { %4019 = sst [smem:[#allocation3_spill]] %s3985_s5  ;;  %v2653_v63 = vld [vmem:[%s3995_s10] ss:$0 sm:$0xff]  ;;  %s3119_s5 = smov 32   ;;  %vm1741_vm4 = vcmask 519170   ;;  %vm1959_vm5 = vcmask 523270  }
   0x2   :  { %4020 = sst [smem:[#allocation4_spill]] %s3986_s1  ;;  %vm1850_vm6 = vcmask 521220  }
   0x3   :  { %4021 = sst [smem:[#allocation5_spill]] %s3987_s2 }
   0x4   :  { %4022 = sst [smem:[#allocation6_spill]] %s3988_s7 }
   0x5   :  { %4023 = sst [smem:[#allocation7_spill]] %s3989_s6  ;;  %s3123_s6 = smov 112  }
   0x6   :  { %4024 = sst [smem:[#allocation8_spill]] %s3990_s9 }
   0x7   :  { %4025 = sst [smem:[#allocation9_spill]] %s3991_s8 }
   0x8   :  { %4026 = sst [smem:[#allocation10_spill]] %s3992_s4 }
   0x9   :  { %4027 = sst [smem:[#allocation11_spill]] %s3993_s11  ;;  %s3122_s11 = smov 96  }
   0xa   :  { %4028 = sst [smem:[#allocation12_spill]] %s3994_s13 }
   0xb   :  { %s4029_s8 = sld [smem:[#allocation3_spill]] }
   0xc   :  { %s4030_s1 = sld [smem:[#allocation4_spill]] }
   0xd   :  { %s4031_s7 = sld [smem:[#allocation5_spill]] }
   0xe   :  { %s4032_s27 = sld [smem:[#allocation6_spill]] }
   0xf   :  { %s4033_s28 = sld [smem:[#allocation7_spill]] }
  0x10   :  { %s4034_s13 = sld [smem:[#allocation8_spill]] }
  0x11   :  { %v91_v0 = vld [vmem:[%s4029_s8 + $0x18] sm:$0xff]  ;;  %v90_v1 = vld [vmem:[%s4029_s8 + $0x10] sm:$0xff]  ;;  %v89_v3 = vld [vmem:[%s4029_s8 + $0x8] sm:$0xff]  ;;  %s4035_s26 = sld [smem:[#allocation9_spill]] }
  0x12   :  { %2839 = vmatprep.subr.mxu0 %v91_v0  ;;  %v3263_v2 = vld [vmem:[%s4030_s1] sm:$0xff]  ;;  %v3276_v5 = vld [vmem:[%s4030_s1 + $0x8] sm:$0xff]  ;;  %v3281_v6 = vld [vmem:[%s4030_s1 + $0x10] sm:$0xff] }
  0x13   :  { %2840 = vmatpush3.msra.mxu0 %v91_v0  ;;  %2847 = vmatprep.mubr.msk.f32.mxu0 %vm99_vm0, %v3263_v2  ;;  %v88_v4 = vld [vmem:[%s4029_s8] sm:$0xff]  ;;  %v3290_v7 = vld [vmem:[%s4030_s1 + $0x18] sm:$0xff]  ;;  %v3307_v19 = vld [vmem:[%s4031_s7 + $0x8] sm:$0xff]  ;;  %s4037_s8 = sld [smem:[#allocation11_spill]] }
  0x14   :  { %2841 = vmatprep.subr.mxu0 %v90_v1  ;;  %v84_v8 = vld [vmem:[%s4031_s7] sm:$0xff]  ;;  %v301_v9 = vld [vmem:[%s4032_s27 + $0x18] sm:$0xff]  ;;  %v3312_v20 = vld [vmem:[%s4031_s7 + $0x10] sm:$0xff] }
  0x15   :  { %2842 = vmatpush3.msra.mxu0 %v90_v1  ;;  %2861 = vmatprep.mubr.msk.f32.mxu1 %vm99_vm0, %v84_v8  ;;  %v2631_v12 = vld [vmem:[%s4033_s28] ss:$0 sm:$0xff]  ;;  %v3321_v21 = vld [vmem:[%s4031_s7 + $0x18] sm:$0xff]  ;;  %v300_v22 = vld [vmem:[%s4032_s27 + $0x10] sm:$0xff]  ;;  %s4036_s7 = sld [smem:[#allocation10_spill]] }
  0x16   :  { %2843 = vmatprep.subr.mxu0 %v89_v3  ;;  %v299_v23 = vld [vmem:[%s4032_s27 + $0x8] sm:$0xff]  ;;  %v298_v24 = vld [vmem:[%s4032_s27] sm:$0xff]  ;;  %v498_v25 = vld [vmem:[%s4034_s13 + $0x18] sm:$0xff] }
  0x17   :  { %2844 = vmatpush3.msra.mxu0 %v89_v3  ;;  %v497_v31 = vld [vmem:[%s4034_s13 + $0x10] sm:$0xff]  ;;  %v496_v34 = vld [vmem:[%s4034_s13 + $0x8] sm:$0xff]  ;;  %v495_v36 = vld [vmem:[%s4034_s13] sm:$0xff]  ;;  %s4038_s13 = sld [smem:[#allocation12_spill]] }
  0x18   :  { %2845 = vmatprep.subr.mxu0 %v88_v4  ;;  %v2640_v39 = vld [vmem:[%s4035_s26] ss:$0 sm:$0xff]  ;;  %s3118_s26 = smov 16  }
  0x19   :  { %2846 = vmatpush3.msra.mxu0 %v88_v4  ;;  %v503_v54 = vld [vmem:[%s4037_s8 + $0x18] sm:$0xff]  ;;  %v502_v55 = vld [vmem:[%s4037_s8 + $0x10] sm:$0xff]  ;;  %v501_v56 = vld [vmem:[%s4037_s8 + $0x8] sm:$0xff] }
  0x1a   :  { %2848 = vmatmul.mubr.msk.f32.vlgmr.msra.gmra.mxu0 %vm99_vm0, %v3276_v5  ;;  %2867 = vmatprep.subr.mxu0 %v301_v9  ;;  %v500_v57 = vld [vmem:[%s4037_s8] sm:$0xff] }
  0x1b   :  { %2850 = vmatprep.mubr.msk.f32.mxu0 %vm99_vm0, %v3281_v6  ;;  %2868 = vmatpush3.msra.mxu0 %v301_v9  ;;  %v491_v50 = vld [vmem:[%s4036_s7] sm:$0xff]  ;;  %v3375_v51 = vld [vmem:[%s4036_s7 + $0x8] sm:$0xff]  ;;  %v3380_v52 = vld [vmem:[%s4036_s7 + $0x10] sm:$0xff] }
  0x1c   :  { %2869 = vmatprep.subr.mxu0 %v300_v22  ;;  %v3389_v53 = vld [vmem:[%s4036_s7 + $0x18] sm:$0xff] }
  0x1d   :  { %2870 = vmatpush3.msra.mxu0 %v300_v22  ;;  %v892_v58 = vld [vmem:[%s4038_s13 + $0x18] sm:$0xff] }
  0x1e   :  { %2851 = vmatmul.mubr.msk.f32.gmra.mxu0 %vm99_vm0, %v3290_v7  ;;  %2871 = vmatprep.subr.mxu0 %v299_v23 }
  0x1f   :  { %2872 = vmatpush3.msra.mxu0 %v299_v23 }
  0x20   :  { %2873 = vmatprep.subr.mxu0 %v298_v24 }
  0x21   :  { %2874 = vmatpush3.msra.mxu0 %v298_v24  ;;  %v3454_v24 = vld [vmem:[%s3996_s3 + $0x8] sm:$0xff] }
  0x22   :  { %2895 = vmatprep.subr.mxu0 %v498_v25 }
  0xda   :  { %v2849_v10 = vpop.f32.mrf.mxu0 }
  0xdb   :  { %v184_v17 = vadd.f32 %v2849_v10, %v2631_v12 }
  0xdc   :  { %v178_v11 = vpop.f32.mrf.mxu0 }
  0xdd   :  { %v179_v18 = vadd.f32 %v2631_v12, %v178_v11 }
  0xde   :  { %v2852_v13 = vpop.f32.mrf.mxu0 }
  0xdf   :  { %v194_v14 = vadd.f32 %v2852_v13, %v2631_v12 }
  0xe0   :  { %v188_v15 = vpop.f32.mrf.mxu0 }
  0xe1   :  { %v189_v16 = vadd.f32 %v2631_v12, %v188_v15  ;;  %2853 = vmatprep.subr.mxu1 %v194_v14 }
  0xe2   :  { %2854 = vmatpush3.msra.mxu1 %v194_v14  ;;  %v891_v14 = vld [vmem:[%s4038_s13 + $0x10] sm:$0xff] }
  0xe3   :  { %2855 = vmatprep.subr.mxu1 %v189_v16 }
  0xe4   :  { %2856 = vmatpush3.msra.mxu1 %v189_v16  ;;  %v890_v16 = vld [vmem:[%s4038_s13 + $0x8] sm:$0xff] }
  0xe5   :  { %2857 = vmatprep.subr.mxu1 %v184_v17 }
  0xe6   :  { %2858 = vmatpush3.msra.mxu1 %v184_v17 }
  0xe7   :  { %2859 = vmatprep.subr.mxu1 %v179_v18 }
  0xe8   :  { %2860 = vmatpush3.msra.mxu1 %v179_v18  ;;  %v889_v18 = vld [vmem:[%s4038_s13] sm:$0xff] }
  0xe9   :  { %2862 = vmatmul.mubr.msk.f32.vlgmr.msra.gmra.mxu1 %vm99_vm0, %v3307_v19 }
  0xea   :  { %2864 = vmatprep.mubr.msk.f32.mxu1 %vm99_vm0, %v3312_v20 }
  0xed   :  { %2865 = vmatmul.mubr.msk.f32.gmra.mxu1 %vm99_vm0, %v3321_v21 }
  0xee   :  { %2889 = vmatprep.mubr.msk.f32.mxu1 %vm99_vm0, %v84_v8 }
 0x1a9   :  { %v2863_v26 = vpop.f32.mrf.mxu1 }
 0x1aa   :  { %v295_v29 = vmax.f32 %v2863_v26, 0.0  ;;  %v3468_v26 = vld [vmem:[%s3996_s3 + $0x18] sm:$0xff] }
 0x1ab   :  { %v275_v27 = vpop.f32.mrf.mxu1 }
 0x1ac   :  { %v294_v28 = vmax.f32 %v275_v27, 0.0  ;;  %v897_v27 = vld [vmem:[%s3997_s15 + $0x18] sm:$0xff] }
 0x1ad   :  { %v2866_v30 = vpop.f32.mrf.mxu1 }
 0x1ae   :  { %2875 = vmatprep.mubr.msk.f32.mxu0 %vm99_vm0, %v294_v28  ;;  %v297_v35 = vmax.f32 %v2866_v30, 0.0  ;;  %v896_v28 = vld [vmem:[%s3997_s15 + $0x10] sm:$0xff]  ;;  %v894_v30 = vld [vmem:[%s3997_s15] sm:$0xff] }
 0x1af   :  { %v285_v32 = vpop.f32.mrf.mxu1  ;;  %2876 = vmatmul.mubr.msk.f32.vlgmr.msra.gmra.mxu0 %vm99_vm0, %v295_v29  ;;  %v895_v29 = vld [vmem:[%s3997_s15 + $0x8] sm:$0xff] }
 0x1b0   :  { %v296_v33 = vmax.f32 %v285_v32, 0.0  ;;  %2896 = vmatpush3.msra.mxu0 %v498_v25  ;;  %v3459_v25 = vld [vmem:[%s3996_s3 + $0x10] sm:$0xff] }
 0x1b1   :  { %2897 = vmatprep.subr.mxu0 %v497_v31 }
 0x1b2   :  { %2878 = vmatprep.mubr.msk.f32.mxu0 %vm99_vm0, %v296_v33  ;;  %2898 = vmatpush3.msra.mxu0 %v497_v31  ;;  %v2662_v31 = vld [vmem:[%s3998_s12] ss:$0 sm:$0xff] }
 0x1b3   :  { %2879 = vmatmul.mubr.msk.f32.gmra.mxu0 %vm99_vm0, %v297_v35  ;;  %2899 = vmatprep.subr.mxu0 %v496_v34 }
 0x1b4   :  { %2900 = vmatpush3.msra.mxu0 %v496_v34  ;;  %2903 = vmatprep.mubr.msk.f32.mxu0 %vm99_vm0, %v3263_v2 }
 0x1b5   :  { %2901 = vmatprep.subr.mxu0 %v495_v36 }
 0x1b6   :  { %2902 = vmatpush3.msra.mxu0 %v495_v36 }
 0x1b7   :  { %2904 = vmatmul.mubr.msk.f32.vlgmr.msra.gmra.mxu0 %vm99_vm0, %v3276_v5  ;;  %2923 = vmatprep.subr.mxu0 %v503_v54 }
 0x1b8   :  { %2906 = vmatprep.mubr.msk.f32.mxu0 %vm99_vm0, %v3281_v6  ;;  %2924 = vmatpush3.msra.mxu0 %v503_v54 }
 0x1b9   :  { %2925 = vmatprep.subr.mxu0 %v502_v55 }
 0x1ba   :  { %2926 = vmatpush3.msra.mxu0 %v502_v55 }
 0x1bb   :  { %2907 = vmatmul.mubr.msk.f32.gmra.mxu0 %vm99_vm0, %v3290_v7  ;;  %2927 = vmatprep.subr.mxu0 %v501_v56 }
 0x1bc   :  { %2928 = vmatpush3.msra.mxu0 %v501_v56 }
 0x1bd   :  { %2929 = vmatprep.subr.mxu0 %v500_v57 }
 0x1be   :  { %2930 = vmatpush3.msra.mxu0 %v500_v57 }
 0x1bf   :  { %2951 = vmatprep.subr.mxu0 %v892_v58 }
 0x26f   :  { %v2877_v37 = vpop.f32.mrf.mxu0 }
 0x270   :  { %v393_v45 = vadd.f32 %v2877_v37, %v2640_v39 }
 0x271   :  { %v387_v38 = vpop.f32.mrf.mxu0 }
 0x272   :  { %v388_v47 = vadd.f32 %v2640_v39, %v387_v38 }
 0x273   :  { %v2880_v40 = vpop.f32.mrf.mxu0 }
 0x274   :  { %v403_v41 = vadd.f32 %v2880_v40, %v2640_v39 }
 0x275   :  { %v397_v42 = vpop.f32.mrf.mxu0 }
 0x276   :  { %v398_v43 = vadd.f32 %v2640_v39, %v397_v42  ;;  %2881 = vmatprep.subr.mxu1 %v403_v41  ;;  %v2671_v39 = vld [vmem:[%s3999_s14] ss:$0 sm:$0xff] }
 0x277   :  { %2882 = vmatpush3.msra.mxu1 %v403_v41  ;;  %v2905_v44 = vpop.f32.mrf.mxu0 }
 0x278   :  { %2883 = vmatprep.subr.mxu1 %v398_v43 }
 0x279   :  { %2884 = vmatpush3.msra.mxu1 %v398_v43  ;;  %v571_v46 = vpop.f32.mrf.mxu0 }
 0x27a   :  { %2885 = vmatprep.subr.mxu1 %v393_v45 }
 0x27b   :  { %2886 = vmatpush3.msra.mxu1 %v393_v45  ;;  %v2908_v48 = vpop.f32.mrf.mxu0 }
 0x27c   :  { %2887 = vmatprep.subr.mxu1 %v388_v47 }
 0x27d   :  { %2888 = vmatpush3.msra.mxu1 %v388_v47  ;;  %v581_v49 = vpop.f32.mrf.mxu0 }
 0x27e   :  { %2890 = vmatmul.mubr.msk.f32.vlgmr.msra.gmra.mxu1 %vm99_vm0, %v3307_v19  ;;  %2909 = vmatprep.subr.mxu1 %v2908_v48 }
 0x27f   :  { %2910 = vmatpush3.msra.mxu1 %v2908_v48  ;;  %2892 = vmatprep.mubr.msk.f32.mxu1 %vm99_vm0, %v3312_v20 }
 0x280   :  { %2911 = vmatprep.subr.mxu1 %v581_v49 }
 0x281   :  { %2912 = vmatpush3.msra.mxu1 %v581_v49 }
 0x282   :  { %2893 = vmatmul.mubr.msk.f32.gmra.mxu1 %vm99_vm0, %v3321_v21  ;;  %2913 = vmatprep.subr.mxu1 %v2905_v44 }
 0x283   :  { %2914 = vmatpush3.msra.mxu1 %v2905_v44  ;;  %2917 = vmatprep.mubr.msk.f32.mxu1 %vm99_vm0, %v491_v50 }
 0x284   :  { %2915 = vmatprep.subr.mxu1 %v571_v46 }
 0x285   :  { %2916 = vmatpush3.msra.mxu1 %v571_v46 }
 0x286   :  { %2918 = vmatmul.mubr.msk.f32.vlgmr.msra.gmra.mxu1 %vm99_vm0, %v3375_v51 }
 0x287   :  { %2920 = vmatprep.mubr.msk.f32.mxu1 %vm99_vm0, %v3380_v52 }
 0x28a   :  { %2921 = vmatmul.mubr.msk.f32.gmra.mxu1 %vm99_vm0, %v3389_v53 }
 0x28b   :  { %2945 = vmatprep.mubr.msk.f32.mxu1 %vm99_vm0, %v491_v50 }
 0x33e   :  { %v3409_v59 = vpop.f32.mrf.mxu1 }
 0x340   :  { %v3411_v60 = vpop.f32.mrf.mxu1 }
 0x342   :  { %v3413_v61 = vpop.f32.mrf.mxu1 }
 0x344   :  { %v3415_v62 = vpop.f32.mrf.mxu1 }
 0x346   :  { %v2919_v0 = vpop.f32.mrf.mxu1 }
 0x347   :  { %v680_v1 = vadd.f32 %v2919_v0, %v2653_v63  ;;  %v1300_v0 = vld [vmem:[%s4001_s0] sm:$0xff] }
 0x348   :  { %v674_v3 = vpop.f32.mrf.mxu1 }
 0x349   :  { %v675_v4 = vadd.f32 %v2653_v63, %v674_v3  ;;  %v694_v10 = vmax.f32 %v680_v1, 0.0  ;;  %v2680_v1 = vld [vmem:[%s4000_s16] ss:$0 sm:$0xff] }
 0x34a   :  { %v2922_v8 = vpop.f32.mrf.mxu1 }
 0x34b   :  { %v693_v9 = vmax.f32 %v675_v4, 0.0  ;;  %v690_v11 = vadd.f32 %v2922_v8, %v2653_v63  ;;  %v1418_v8 = vld [vmem:[%s4002_s17 + $0x78] sm:$0xff] }
 0x34c   :  { %v684_v12 = vpop.f32.mrf.mxu1 }
 0x34d   :  { %v685_v13 = vadd.f32 %v2653_v63, %v684_v12  ;;  %2931 = vmatprep.mubr.msk.f32.mxu0 %vm99_vm0, %v693_v9  ;;  %v696_v17 = vmax.f32 %v690_v11, 0.0  ;;  %v1417_v9 = vld [vmem:[%s4002_s17 + $0x70] sm:$0xff]  ;;  %v1416_v12 = vld [vmem:[%s4002_s17 + $0x68] sm:$0xff] }
 0x34e   :  { %2932 = vmatmul.mubr.msk.f32.vlgmr.msra.gmra.mxu0 %vm99_vm0, %v694_v10 }
 0x34f   :  { %v695_v15 = vmax.f32 %v685_v13, 0.0  ;;  %2952 = vmatpush3.msra.mxu0 %v892_v58  ;;  %v1415_v13 = vld [vmem:[%s4002_s17 + $0x60] sm:$0xff] }
 0x350   :  { %2953 = vmatprep.subr.mxu0 %v891_v14 }
 0x351   :  { %2934 = vmatprep.mubr.msk.f32.mxu0 %vm99_vm0, %v695_v15  ;;  %2954 = vmatpush3.msra.mxu0 %v891_v14 }
 0x352   :  { %2935 = vmatmul.mubr.msk.f32.gmra.mxu0 %vm99_vm0, %v696_v17  ;;  %2955 = vmatprep.subr.mxu0 %v890_v16  ;;  %v1414_v17 = vld [vmem:[%s4002_s17 + $0x58] sm:$0xff] }
 0x353   :  { %2956 = vmatpush3.msra.mxu0 %v890_v16  ;;  %2959 = vmatprep.mubr.msk.f32.mxu0 %vm99_vm0, %v3263_v2 }
 0x354   :  { %2957 = vmatprep.subr.mxu0 %v889_v18 }
 0x355   :  { %2958 = vmatpush3.msra.mxu0 %v889_v18 }
 0x356   :  { %2960 = vmatmul.mubr.msk.f32.vlgmr.msra.gmra.mxu0 %vm99_vm0, %v3276_v5  ;;  %2979 = vmatprep.subr.mxu0 %v897_v27 }
 0x357   :  { %2962 = vmatprep.mubr.msk.f32.mxu0 %vm99_vm0, %v3281_v6  ;;  %2980 = vmatpush3.msra.mxu0 %v897_v27  ;;  %v1406_v27 = vld [vmem:[%s4002_s17 + $0x18] sm:$0xff] }
 0x358   :  { %2981 = vmatprep.subr.mxu0 %v896_v28 }
 0x359   :  { %2982 = vmatpush3.msra.mxu0 %v896_v28 }
 0x35a   :  { %2963 = vmatmul.mubr.msk.f32.gmra.mxu0 %vm99_vm0, %v3290_v7  ;;  %v885_v7 = vld [vmem:[%s3996_s3] sm:$0xff]  ;;  %2983 = vmatprep.subr.mxu0 %v895_v29 }
 0x35b   :  { %2984 = vmatpush3.msra.mxu0 %v895_v29 }
 0x35c   :  { %2985 = vmatprep.subr.mxu0 %v894_v30 }
 0x35d   :  { %2986 = vmatpush3.msra.mxu0 %v894_v30 }
 0x40e   :  { %v2933_v19 = vpop.f32.mrf.mxu0 }
 0x410   :  { %v775_v20 = vpop.f32.mrf.mxu0 }
 0x412   :  { %v2936_v21 = vpop.f32.mrf.mxu0 }
 0x413   :  { %2937 = vmatprep.subr.mxu1 %v2936_v21 }
 0x414   :  { %v785_v22 = vpop.f32.mrf.mxu0  ;;  %2938 = vmatpush3.msra.mxu1 %v2936_v21 }
 0x415   :  { %2939 = vmatprep.subr.mxu1 %v785_v22 }
 0x416   :  { %2940 = vmatpush3.msra.mxu1 %v785_v22  ;;  %v2961_v2 = vpop.f32.mrf.mxu0  ;;  %v1412_v22 = vld [vmem:[%s4002_s17 + $0x48] sm:$0xff] }
 0x417   :  { %2941 = vmatprep.subr.mxu1 %v2933_v19 }
 0x418   :  { %2942 = vmatpush3.msra.mxu1 %v2933_v19  ;;  %v965_v23 = vpop.f32.mrf.mxu0  ;;  %v1413_v19 = vld [vmem:[%s4002_s17 + $0x50] sm:$0xff] }
 0x419   :  { %2943 = vmatprep.subr.mxu1 %v775_v20 }
 0x41a   :  { %2944 = vmatpush3.msra.mxu1 %v775_v20  ;;  %v2964_v5 = vpop.f32.mrf.mxu0 }
 0x41b   :  { %2946 = vmatmul.mubr.msk.f32.vlgmr.msra.gmra.mxu1 %vm99_vm0, %v3375_v51  ;;  %2965 = vmatprep.subr.mxu1 %v2964_v5 }
 0x41c   :  { %v975_v6 = vpop.f32.mrf.mxu0  ;;  %2966 = vmatpush3.msra.mxu1 %v2964_v5  ;;  %2948 = vmatprep.mubr.msk.f32.mxu1 %vm99_vm0, %v3380_v52  ;;  %v1410_v5 = vld [vmem:[%s4002_s17 + $0x38] sm:$0xff] }
 0x41d   :  { %2967 = vmatprep.subr.mxu1 %v975_v6 }
 0x41e   :  { %2968 = vmatpush3.msra.mxu1 %v975_v6 }
 0x41f   :  { %2949 = vmatmul.mubr.msk.f32.gmra.mxu1 %vm99_vm0, %v3389_v53  ;;  %2969 = vmatprep.subr.mxu1 %v2961_v2 }
 0x420   :  { %2970 = vmatpush3.msra.mxu1 %v2961_v2  ;;  %2973 = vmatprep.mubr.msk.f32.mxu1 %vm99_vm0, %v885_v7  ;;  %v1411_v2 = vld [vmem:[%s4002_s17 + $0x40] sm:$0xff] }
 0x421   :  { %2971 = vmatprep.subr.mxu1 %v965_v23 }
 0x422   :  { %2972 = vmatpush3.msra.mxu1 %v965_v23 }
 0x423   :  { %2974 = vmatmul.mubr.msk.f32.vlgmr.msra.gmra.mxu1 %vm99_vm0, %v3454_v24 }
 0x424   :  { %2976 = vmatprep.mubr.msk.f32.mxu1 %vm99_vm0, %v3459_v25 }
 0x427   :  { %2977 = vmatmul.mubr.msk.f32.gmra.mxu1 %vm99_vm0, %v3468_v26 }
 0x428   :  { %3001 = vmatprep.mubr.msk.f32.mxu1 %vm99_vm0, %v885_v7  ;;  %v1409_v7 = vld [vmem:[%s4002_s17 + $0x30] sm:$0xff] }
 0x4db   :  { %v2947_v32 = vpop.f32.mrf.mxu1 }
 0x4dc   :  { %v872_v33 = vadd.f32 %v2947_v32, %v2662_v31 }
 0x4dd   :  { %v866_v34 = vpop.f32.mrf.mxu1 }
 0x4de   :  { %1285 = vrot.lane.b32.xlu1 %v872_v33, %s3118_s26  ;;  %v867_v36 = vadd.f32 %v2662_v31, %v866_v34 }
 0x4df   :  { %v2950_v35 = vpop.f32.mrf.mxu1 }
 0x4e0   :  { %v882_v37 = vadd.f32 %v2950_v35, %v2662_v31 }
 0x4e1   :  { %v876_v38 = vpop.f32.mrf.mxu1 }
 0x4e2   :  { %1289 = vrot.lane.b32.xlu0 %v882_v37, %s3118_s26  ;;  %1283 = vrot.lane.b32.xlu1 %v867_v36, %s3118_s26  ;;  %v877_v41 = vadd.f32 %v2662_v31, %v876_v38  ;;  %v3586_v36 = vld [vmem:[%s4003_s19 + $0x60] sm:$0xff]  ;;  %v3592_v37 = vld [vmem:[%s4003_s19 + $0x58] sm:$0xff] }
 0x4e3   :  { %v2975_v40 = vpop.f32.mrf.mxu1  ;;  %v3598_v38 = vld [vmem:[%s4003_s19 + $0x50] sm:$0xff] }
 0x4e4   :  { %v1074_v42 = vadd.f32 %v2975_v40, %v2671_v39  ;;  %v3610_v40 = vld [vmem:[%s4003_s19 + $0x40] sm:$0xff] }
 0x4e5   :  { %v1068_v43 = vpop.f32.mrf.mxu1 }
 0x4e6   :  { %v1069_v44 = vadd.f32 %v2671_v39, %v1068_v43  ;;  %1287 = vrot.lane.b32.xlu0 %v877_v41, %s3118_s26  ;;  %v1088_v47 = vmax.f32 %v1074_v42, 0.0  ;;  %v3616_v41 = vld [vmem:[%s4003_s19 + $0x38] sm:$0xff]  ;;  %v3622_v42 = vld [vmem:[%s4003_s19 + $0x30] sm:$0xff]  ;;  %v3628_v43 = vld [vmem:[%s4003_s19 + $0x28] sm:$0xff] }
 0x4e7   :  { %v2978_v45 = vpop.f32.mrf.mxu1 }
 0x4e8   :  { %v1087_v46 = vmax.f32 %v1069_v44, 0.0  ;;  %v1084_v48 = vadd.f32 %v2978_v45, %v2671_v39  ;;  %v3634_v44 = vld [vmem:[%s4003_s19 + $0x20] sm:$0xff]  ;;  %v3642_v45 = vld [vmem:[%s4003_s19 + $0x18] sm:$0xff] }
 0x4e9   :  { %v1078_v49 = vpop.f32.mrf.mxu1 }
 0x4ea   :  { %v1079_v50 = vadd.f32 %v2671_v39, %v1078_v49  ;;  %2987 = vmatprep.mubr.msk.f32.mxu0 %vm99_vm0, %v1087_v46  ;;  %v1090_v52 = vmax.f32 %v1084_v48, 0.0  ;;  %v3604_v39 = vld [vmem:[%s4003_s19 + $0x48] sm:$0xff]  ;;  %v1405_v46 = vld [vmem:[%s4002_s17 + $0x10] sm:$0xff] }
 0x4eb   :  { %2988 = vmatmul.mubr.msk.f32.vlgmr.msra.gmra.mxu0 %vm99_vm0, %v1088_v47  ;;  %v3651_v47 = vld [vmem:[%s4003_s19 + $0x10] sm:$0xff]  ;;  %v1404_v48 = vld [vmem:[%s4002_s17 + $0x8] sm:$0xff] }
 0x4ec   :  { %v1089_v51 = vmax.f32 %v1079_v50, 0.0  ;;  %v3660_v49 = vld [vmem:[%s4003_s19 + $0x8] sm:$0xff]  ;;  %v1403_v50 = vld [vmem:[%s4002_s17] sm:$0xff] }
 0x4ee   :  { %2990 = vmatprep.mubr.msk.f32.mxu0 %vm99_vm0, %v1089_v51  ;;  %v3669_v51 = vld [vmem:[%s4003_s19] sm:$0xff] }
 0x4ef   :  { %2991 = vmatmul.mubr.msk.f32.gmra.mxu0 %vm99_vm0, %v1090_v52  ;;  %v3120_v52 = vmov 0.0  }
 0x4f0   :  { %3015 = vmatprep.mubr.msk.f32.mxu0 %vm99_vm0, %v1300_v0 }
 0x550   :  { %v1286_v10 = vpop.permute.xlu1 %1285 }
 0x554   :  { %v1290_v58 = vpop.permute.xlu0 %1289  ;;  %v1284_v6 = vpop.permute.xlu1 %1283 }
 0x558   :  { %v1288_v18 = vpop.permute.xlu0 %1287 }
 0x5ab   :  { %v2989_v53 = vpop.f32.mrf.mxu0 }
 0x5ad   :  { %v1169_v54 = vpop.f32.mrf.mxu0 }
 0x5af   :  { %v2992_v55 = vpop.f32.mrf.mxu0 }
 0x5b0   :  { %2993 = vmatprep.subr.mxu1 %v2992_v55 }
 0x5b1   :  { %v1179_v56 = vpop.f32.mrf.mxu0  ;;  %2994 = vmatpush3.msra.mxu1 %v2992_v55  ;;  %v1421_v55 = vlaneseq }
 0x5b2   :  { %2995 = vmatprep.subr.mxu1 %v1179_v56 }
 0x5b3   :  { %2996 = vmatpush3.msra.mxu1 %v1179_v56  ;;  %v1422_v56 = vshrl.u32 %v1421_v55, 7 }
 0x5b4   :  { %2997 = vmatprep.subr.mxu1 %v2989_v53 }
 0x5b5   :  { %2998 = vmatpush3.msra.mxu1 %v2989_v53 }
 0x5b6   :  { %2999 = vmatprep.subr.mxu1 %v1169_v54 }
 0x5b7   :  { %3000 = vmatpush3.msra.mxu1 %v1169_v54 }
 0x5b8   :  { %3002 = vmatmul.mubr.msk.f32.vlgmr.msra.gmra.mxu1 %vm99_vm0, %v3454_v24  ;;  %1454 = vmatprep.subr.mxu1 %v1418_v8 }
 0x5b9   :  { %3004 = vmatprep.mubr.msk.f32.mxu1 %vm99_vm0, %v3459_v25  ;;  %1455 = vmatpush1.msra.mxu1 %v1417_v9  ;;  %v1408_v25 = vld [vmem:[%s4002_s17 + $0x28] sm:$0xff] }
 0x5ba   :  { %1456 = vmatprep.subr.mxu1 %v1416_v12 }
 0x5bb   :  { %1457 = vmatpush1.msra.mxu1 %v1415_v13 }
 0x5bc   :  { %3005 = vmatmul.mubr.msk.f32.gmra.mxu1 %vm99_vm0, %v3468_v26  ;;  %1458 = vmatprep.subr.mxu1 %v1414_v17  ;;  %v1407_v26 = vld [vmem:[%s4002_s17 + $0x20] sm:$0xff] }
 0x5bd   :  { %1459 = vmatpush1.msra.mxu1 %v1413_v19  ;;  %1502 = vmatprep.mubr.f32.mxu1 %v3120_v52 }
 0x5be   :  { %1460 = vmatprep.subr.mxu1 %v1412_v22 }
 0x5bf   :  { %1461 = vmatpush1.msra.mxu1 %v1411_v2 }
 0x5c0   :  { %1462 = vmatprep.subr.mxu1 %v1410_v5 }
 0x5c1   :  { %1463 = vmatpush1.msra.mxu1 %v1409_v7 }
 0x5c2   :  { %1464 = vmatprep.subr.mxu1 %v1408_v25 }
 0x5c3   :  { %1465 = vmatpush1.msra.mxu1 %v1407_v26 }
 0x5c4   :  { %1466 = vmatprep.subr.mxu1 %v1406_v27 }
 0x5c5   :  { %1467 = vmatpush1.msra.mxu1 %v1405_v46 }
 0x5c6   :  { %1468 = vmatprep.subr.mxu1 %v1404_v48 }
 0x5c7   :  { %1469 = vmatpush1.msra.mxu1 %v1403_v50 }
 0x678   :  { %v3003_v57 = vpop.f32.mrf.mxu1 }
 0x679   :  { %v1266_v14 = vadd.f32 %v3003_v57, %v2680_v1  ;;  %v1423_v57 = vsub.s32 0, %v1422_v56 }
 0x67a   :  { %v1260_v63 = vpop.f32.mrf.mxu1 }
 0x67b   :  { %v1261_v20 = vadd.f32 %v2680_v1, %v1260_v63  ;;  %v1297_v23 = vsel %vm1295_vm1, %v1266_v14, %v1286_v10  ;;  %v1427_v14 = vsub.s32 1, %v1422_v56 }
 0x67c   :  { %v3006_v3 = vpop.f32.mrf.mxu1 }
 0x67d   :  { %v1276_v4 = vadd.f32 %v3006_v3, %v2680_v1  ;;  %v1296_v24 = vsel %vm1295_vm1, %v1261_v20, %v1284_v6 }
 0x67e   :  { %v1270_v11 = vpop.f32.mrf.mxu1 }
 0x67f   :  { %v1271_v15 = vadd.f32 %v2680_v1, %v1270_v11  ;;  %v1299_v16 = vsel %vm1295_vm1, %v1276_v4, %v1290_v58  ;;  %v1419_v58 = vld [vmem:[%s4004_s18] sm:$0x3]  ;;  %s3121_s18 = smov 64  }
 0x680   :  { %1312 = vrot.lane.b32.xlu0 %v1299_v16, %s3119_s5  ;;  %v1424_v63 = vrot.slane %v1419_v58, %v1423_v57  ;;  %v3727_v17 = vrot.slane %v1419_v58, %v1427_v14 }
 0x681   :  { %v1298_v21 = vsel %vm1295_vm1, %v1271_v15, %v1288_v18  ;;  %v3725_v15 = vld [vmem:[%s4005_s20] ss:$0 sm:$0xff] }
 0x682   :  { %1310 = vrot.lane.b32.xlu1 %v1298_v21, %s3119_s5 }
 0x684   :  { %1308 = vrot.lane.b32.xlu0 %v1297_v23, %s3119_s5 }
 0x686   :  { %1306 = vrot.lane.b32.xlu1 %v1296_v24, %s3119_s5 }
 0x6f2   :  { %v1313_v28 = vpop.permute.xlu0 %1312 }
 0x6f3   :  { %v1321_v29 = vsel %vm99_vm0, %v3413_v61, %v1313_v28  ;;  %v1301_v61 = vld [vmem:[%s4001_s0 + $0x8] sm:$0xff] }
 0x6f4   :  { %3007 = vmatprep.subr.mxu0 %v1321_v29  ;;  %v1311_v30 = vpop.permute.xlu1 %1310 }
 0x6f5   :  { %3008 = vmatpush3.msra.mxu0 %v1321_v29  ;;  %v1320_v31 = vsel %vm99_vm0, %v3415_v62, %v1311_v30  ;;  %v3569_v62 = vld [vmem:[%s4003_s19 + $0x78] sm:$0xff] }
 0x6f6   :  { %v1309_v32 = vpop.permute.xlu0 %1308  ;;  %3009 = vmatprep.subr.mxu0 %v1320_v31  ;;  %1655 = vmatprep.subr.mxu1 %v3569_v62 }
 0x6f7   :  { %3010 = vmatpush3.msra.mxu0 %v1320_v31  ;;  %v1319_v33 = vsel %vm99_vm0, %v3409_v59, %v1309_v32  ;;  %v3574_v59 = vld [vmem:[%s4003_s19 + $0x70] sm:$0xff] }
 0x6f8   :  { %3011 = vmatprep.subr.mxu0 %v1319_v33  ;;  %v1307_v34 = vpop.permute.xlu1 %1306 }
 0x6f9   :  { %3012 = vmatpush3.msra.mxu0 %v1319_v33  ;;  %v1318_v35 = vsel %vm99_vm0, %v3411_v60, %v1307_v34  ;;  %v3579_v60 = vld [vmem:[%s4003_s19 + $0x68] sm:$0xff] }
 0x6fa   :  { %3013 = vmatprep.subr.mxu0 %v1318_v35 }
 0x6fb   :  { %3014 = vmatpush3.msra.mxu0 %v1318_v35 }
 0x6fc   :  { %3016 = vmatmul.mubr.msk.f32.vlgmr.msra.gmra.mxu0 %vm99_vm0, %v1301_v61  ;;  %1557 = vmatprep.subr.mxu0 %v3569_v62 }
 0x6fd   :  { %1558 = vmatpush1.msra.mxu0 %v3574_v59  ;;  %1605 = vmatprep.mubr.f32.mxu0 %v3120_v52 }
 0x6fe   :  { %1559 = vmatprep.subr.mxu0 %v3579_v60 }
 0x6ff   :  { %1560 = vmatpush1.msra.mxu0 %v3586_v36 }
 0x700   :  { %1561 = vmatprep.subr.mxu0 %v3592_v37 }
 0x701   :  { %1562 = vmatpush1.msra.mxu0 %v3598_v38 }
 0x702   :  { %1563 = vmatprep.subr.mxu0 %v3604_v39 }
 0x703   :  { %1564 = vmatpush1.msra.mxu0 %v3610_v40 }
 0x704   :  { %1565 = vmatprep.subr.mxu0 %v3616_v41 }
 0x705   :  { %1566 = vmatpush1.msra.mxu0 %v3622_v42 }
 0x706   :  { %1567 = vmatprep.subr.mxu0 %v3628_v43 }
 0x707   :  { %1568 = vmatpush1.msra.mxu0 %v3634_v44 }
 0x708   :  { %1569 = vmatprep.subr.mxu0 %v3642_v45 }
 0x709   :  { %1570 = vmatpush1.msra.mxu0 %v3651_v47 }
 0x70a   :  { %1571 = vmatprep.subr.mxu0 %v3660_v49 }
 0x70b   :  { %1572 = vmatpush1.msra.mxu0 %v3669_v51 }
 0x70c   :  { %1606 = vmatmul.mubr.f32.vlgmr.msra.gmra.mxu0 %v3120_v52  ;;  %1764 = vmatprep.subr.mxu0 %v3569_v62 }
 0x70d   :  { %1812 = vmatprep.mubr.f32.mxu0 %v3120_v52  ;;  %1765 = vmatpush1.msra.mxu0 %v3574_v59 }
 0x70e   :  { %1766 = vmatprep.subr.mxu0 %v3579_v60 }
 0x70f   :  { %1767 = vmatpush1.msra.mxu0 %v3586_v36 }
 0x710   :  { %1768 = vmatprep.subr.mxu0 %v3592_v37 }
 0x711   :  { %1769 = vmatpush1.msra.mxu0 %v3598_v38 }
 0x712   :  { %1770 = vmatprep.subr.mxu0 %v3604_v39 }
 0x713   :  { %1771 = vmatpush1.msra.mxu0 %v3610_v40 }
 0x714   :  { %1772 = vmatprep.subr.mxu0 %v3616_v41 }
 0x715   :  { %1773 = vmatpush1.msra.mxu0 %v3622_v42 }
 0x716   :  { %1774 = vmatprep.subr.mxu0 %v3628_v43 }
 0x717   :  { %1775 = vmatpush1.msra.mxu0 %v3634_v44 }
 0x718   :  { %1776 = vmatprep.subr.mxu0 %v3642_v45 }
 0x719   :  { %1777 = vmatpush1.msra.mxu0 %v3651_v47 }
 0x71a   :  { %1778 = vmatprep.subr.mxu0 %v3660_v49 }
 0x71b   :  { %1779 = vmatpush1.msra.mxu0 %v3669_v51 }
 0x71c   :  { %1982 = vmatprep.subr.mxu0 %v3569_v62 }
 0x7bc   :  { %v3017_v53 = vpop.f32.mrf.mxu0 }
 0x7be   :  { %v1394_v54 = vpop.f32.mrf.mxu0 }
 0x7bf   :  { %2687 = vmatmul.mubr.msk.f32.vlgmr.msra.gmra.mxu1 %vm1431_vm2, %v1394_v54 }
 0x7c0   :  { %1508 = vmatprep.mubr.f32.mxu1 %v3120_v52  ;;  %1656 = vmatpush1.msra.mxu1 %v3574_v59 }
 0x7c1   :  { %1657 = vmatprep.subr.mxu1 %v3579_v60 }
 0x7c2   :  { %1658 = vmatpush1.msra.mxu1 %v3586_v36 }
 0x7c3   :  { %2688 = vmatmul.mubr.msk.f32.gmra.mxu1 %vm1431_vm2, %v3017_v53  ;;  %1659 = vmatprep.subr.mxu1 %v3592_v37 }
 0x7c4   :  { %1660 = vmatpush1.msra.mxu1 %v3598_v38  ;;  %1703 = vmatprep.mubr.f32.mxu1 %v3120_v52 }
 0x7c5   :  { %1661 = vmatprep.subr.mxu1 %v3604_v39 }
 0x7c6   :  { %1662 = vmatpush1.msra.mxu1 %v3610_v40 }
 0x7c7   :  { %1663 = vmatprep.subr.mxu1 %v3616_v41 }
 0x7c8   :  { %1664 = vmatpush1.msra.mxu1 %v3622_v42 }
 0x7c9   :  { %1665 = vmatprep.subr.mxu1 %v3628_v43 }
 0x7ca   :  { %1666 = vmatpush1.msra.mxu1 %v3634_v44 }
 0x7cb   :  { %1667 = vmatprep.subr.mxu1 %v3642_v45 }
 0x7cc   :  { %1668 = vmatpush1.msra.mxu1 %v3651_v47  ;;  %v1607_v3 = vpop.f32.mrf.mxu0 }
 0x7cd   :  { %1669 = vmatprep.subr.mxu1 %v3660_v49 }
 0x7ce   :  { %1670 = vmatpush1.msra.mxu1 %v3669_v51  ;;  %v1609_v16 = vpop.f32.mrf.mxu0 }
 0x7cf   :  { %1873 = vmatprep.subr.mxu1 %v3569_v62  ;;  %v1619_v18 = vadd.f32 %v3725_v15, %v1609_v16 }
 0x87f   :  { %v1504_v0 = vpop.f32.mrf.mxu1 }
 0x880   :  { %v3717_v1 = vadd.f32 %v1504_v0, %v1424_v63 }
 0x881   :  { %v1506_v4 = vpop.f32.mrf.mxu1 }
 0x882   :  { %v1612_v8 = vadd.f32 %v1607_v3, %v3717_v1  ;;  %v3731_v20 = vadd.f32 %v1506_v4, %v3727_v17 }
 0x883   :  { %v1510_v9 = vpop.f32.mrf.mxu1 }
 0x884   :  { %v2690_v10 = vmul.f32 -1.442695, %v1612_v8  ;;  %v3720_v11 = vadd.f32 %v1510_v9, %v1424_v63 }
 0x885   :  { %v3755_v26 = vpop.f32.mrf.mxu1 }
 0x886   :  { %3062 = vpow2.f32 %v2690_v10 }
 0x893   :  { %v3063_v12 = vpop.eup %3062 }
 0x894   :  { %v1616_v13 = vadd.f32 1.0, %v3063_v12 }
 0x896   :  { %3064 = vrcp.f32 %v1616_v13 }
 0x8a3   :  { %v3065_v19 = vpop.eup %3064 }
 0x8a4   :  { %v1620_v21 = vmul.f32 %v3065_v19, %v1619_v18  ;;  %v1623_v23 = vsub.f32 1.0, %v3065_v19  ;;  %v1629_v6 = vmul.f32 0.0, %v3065_v19 }
 0x8a6   :  { %v1621_v22 = vadd.f32 %v1620_v21, %v3731_v20 }
 0x8a8   :  { %3066 = vtanh.f32 %v1621_v22 }
 0x8b5   :  { %v3067_v2 = vpop.eup %3066 }
 0x8b6   :  { %1625 = vrot.lane.b32.xlu0 %v3067_v2, %s3121_s18 }
 0x928   :  { %v1626_v5 = vpop.permute.xlu0 %1625 }
 0x929   :  { %v1628_v7 = vmul.f32 %v1626_v5, %v1623_v23 }
 0x92b   :  { %v1630_v24 = vadd.f32 %v1629_v6, %v1628_v7 }
 0x92d   :  { %1632 = vrot.lane.b32.xlu1 %v1630_v24, %s3121_s18  ;;  %v1733_v35 = vrot.slane %v1630_v24, 6 }
 0x99f   :  { %v1633_v25 = vpop.permute.xlu1 %1632 }
 0x9a0   :  { %1636 = vst.msk [vmem:[#allocation2] sm:$0x3] %vm1635_vm3, %v1633_v25  ;;  %2691 = vmatmul.mubr.msk.f32.vlgmr.msra.gmra.mxu1 %vm1431_vm2, %v1633_v25 }
 0x9a1   :  { %1874 = vmatpush1.msra.mxu1 %v3574_v59  ;;  %1921 = vmatprep.mubr.f32.mxu1 %v3120_v52 }
 0x9a2   :  { %1875 = vmatprep.subr.mxu1 %v3579_v60 }
 0x9a3   :  { %1876 = vmatpush1.msra.mxu1 %v3586_v36 }
 0x9a4   :  { %1877 = vmatprep.subr.mxu1 %v3592_v37 }
 0x9a5   :  { %1878 = vmatpush1.msra.mxu1 %v3598_v38 }
 0x9a6   :  { %1879 = vmatprep.subr.mxu1 %v3604_v39 }
 0x9a7   :  { %1880 = vmatpush1.msra.mxu1 %v3610_v40 }
 0x9a8   :  { %1881 = vmatprep.subr.mxu1 %v3616_v41 }
 0x9a9   :  { %1882 = vmatpush1.msra.mxu1 %v3622_v42 }
 0x9aa   :  { %1883 = vmatprep.subr.mxu1 %v3628_v43 }
 0x9ab   :  { %1884 = vmatpush1.msra.mxu1 %v3634_v44 }
 0x9ac   :  { %1885 = vmatprep.subr.mxu1 %v3642_v45 }
 0x9ad   :  { %1886 = vmatpush1.msra.mxu1 %v3651_v47 }
 0x9ae   :  { %1887 = vmatprep.subr.mxu1 %v3660_v49 }
 0x9af   :  { %1888 = vmatpush1.msra.mxu1 %v3669_v51 }
 0x9b0   :  { %2080 = vmatprep.subr.mxu1 %v3569_v62 }
 0xa60   :  { %v1705_v27 = vpop.f32.mrf.mxu1 }
 0xa61   :  { %v1711_v28 = vrot.slane %v1705_v27, 6 }
 0xa62   :  { %v1707_v33 = vpop.f32.mrf.mxu1 }
 0xa63   :  { %v1713_v29 = vadd.f32 %v1711_v28, %v3717_v1  ;;  %v1720_v34 = vadd.f32 %v3725_v15, %v1707_v33 }
 0xa65   :  { %v2692_v30 = vmul.f32 -1.442695, %v1713_v29  ;;  %v1722_v61 = vrot.slane %v1720_v34, 6 }
 0xa67   :  { %3068 = vpow2.f32 %v2692_v30 }
 0xa74   :  { %v3069_v31 = vpop.eup %3068 }
 0xa75   :  { %v1717_v32 = vadd.f32 1.0, %v3069_v31 }
 0xa77   :  { %3070 = vrcp.f32 %v1717_v32 }
 0xa84   :  { %v3071_v46 = vpop.eup %3070 }
 0xa85   :  { %v1724_v48 = vmul.f32 %v3071_v46, %v1722_v61  ;;  %v1735_v50 = vmul.f32 %v3071_v46, %v1733_v35  ;;  %v1727_v55 = vsub.f32 1.0, %v3071_v46 }
 0xa87   :  { %v1725_v53 = vadd.f32 %v1724_v48, %v3731_v20 }
 0xa89   :  { %3072 = vtanh.f32 %v1725_v53 }
 0xa96   :  { %v3073_v54 = vpop.eup %3072 }
 0xa97   :  { %1729 = vrot.lane.b32.xlu0 %v3073_v54, %s3121_s18 }
 0xb09   :  { %v1730_v56 = vpop.permute.xlu0 %1729 }
 0xb0a   :  { %v1732_v57 = vmul.f32 %v1730_v56, %v1727_v55 }
 0xb0c   :  { %v3761_v58 = vadd.f32 %v1735_v50, %v1732_v57 }
 0xb0e   :  { %v1743_v63 = vrot.slane %v3761_v58, 2  ;;  %v1842_v23 = vrot.slane %v3761_v58, 6 }
 0xb10   :  { %1744 = vrot.lane.b32.xlu1 %v1743_v63, %s3121_s18 }
 0xb82   :  { %v1745_v0 = vpop.permute.xlu1 %1744 }
 0xb83   :  { %2693 = vmatmul.mubr.msk.f32.vlgmr.msra.gmra.mxu0 %vm1431_vm2, %v1745_v0 }
 0xb84   :  { %1983 = vmatpush1.msra.mxu0 %v3574_v59  ;;  %2030 = vmatprep.mubr.f32.mxu0 %v3120_v52 }
 0xb85   :  { %1984 = vmatprep.subr.mxu0 %v3579_v60 }
 0xb86   :  { %1985 = vmatpush1.msra.mxu0 %v3586_v36 }
 0xb87   :  { %1986 = vmatprep.subr.mxu0 %v3592_v37 }
 0xb88   :  { %1987 = vmatpush1.msra.mxu0 %v3598_v38 }
 0xb89   :  { %1988 = vmatprep.subr.mxu0 %v3604_v39 }
 0xb8a   :  { %1989 = vmatpush1.msra.mxu0 %v3610_v40 }
 0xb8b   :  { %1990 = vmatprep.subr.mxu0 %v3616_v41 }
 0xb8c   :  { %1991 = vmatpush1.msra.mxu0 %v3622_v42 }
 0xb8d   :  { %1992 = vmatprep.subr.mxu0 %v3628_v43 }
 0xb8e   :  { %1993 = vmatpush1.msra.mxu0 %v3634_v44 }
 0xb8f   :  { %1994 = vmatprep.subr.mxu0 %v3642_v45 }
 0xb90   :  { %1995 = vmatpush1.msra.mxu0 %v3651_v47 }
 0xb91   :  { %1996 = vmatprep.subr.mxu0 %v3660_v49 }
 0xb92   :  { %1997 = vmatpush1.msra.mxu0 %v3669_v51 }
 0xb93   :  { %2188 = vmatprep.subr.mxu0 %v3569_v62 }
 0xc43   :  { %v1814_v3 = vpop.f32.mrf.mxu0 }
 0xc44   :  { %v1820_v4 = vrot.slane %v1814_v3, 4 }
 0xc45   :  { %v1816_v13 = vpop.f32.mrf.mxu0 }
 0xc46   :  { %v1822_v8 = vadd.f32 %v1820_v4, %v3717_v1  ;;  %v1829_v14 = vadd.f32 %v3725_v15, %v1816_v13 }
 0xc48   :  { %v2694_v9 = vmul.f32 -1.442695, %v1822_v8  ;;  %v1831_v16 = vrot.slane %v1829_v14, 4  ;;  %v3840_v14 = vadd.f32 %v3755_v26, %v3727_v17 }
 0xc4a   :  { %3074 = vpow2.f32 %v2694_v9 }
 0xc57   :  { %v3075_v10 = vpop.eup %3074 }
 0xc58   :  { %v1826_v12 = vadd.f32 1.0, %v3075_v10 }
 0xc5a   :  { %3076 = vrcp.f32 %v1826_v12 }
 0xc67   :  { %v3077_v18 = vpop.eup %3076 }
 0xc68   :  { %v1833_v19 = vmul.f32 %v3077_v18, %v1831_v16  ;;  %v1836_v2 = vsub.f32 1.0, %v3077_v18  ;;  %v1844_v6 = vmul.f32 %v3077_v18, %v1842_v23 }
 0xc6a   :  { %v1834_v21 = vadd.f32 %v1833_v19, %v3731_v20 }
 0xc6c   :  { %3078 = vtanh.f32 %v1834_v21 }
 0xc79   :  { %v3079_v22 = vpop.eup %3078 }
 0xc7a   :  { %1838 = vrot.lane.b32.xlu0 %v3079_v22, %s3121_s18 }
 0xcec   :  { %v1839_v5 = vpop.permute.xlu0 %1838 }
 0xced   :  { %v1841_v7 = vmul.f32 %v1839_v5, %v1836_v2 }
 0xcef   :  { %v3788_v24 = vadd.f32 %v1844_v6, %v1841_v7 }
 0xcf1   :  { %v1852_v25 = vrot.slane %v3788_v24, 4 }
 0xcf3   :  { %1853 = vrot.lane.b32.xlu1 %v1852_v25, %s3121_s18 }
 0xd65   :  { %v1854_v27 = vpop.permute.xlu1 %1853 }
 0xd66   :  { %2695 = vmatmul.mubr.msk.f32.vlgmr.msra.gmra.mxu1 %vm1431_vm2, %v1854_v27 }
 0xd67   :  { %2081 = vmatpush1.msra.mxu1 %v3574_v59  ;;  %2128 = vmatprep.mubr.f32.mxu1 %v3120_v52 }
 0xd68   :  { %2082 = vmatprep.subr.mxu1 %v3579_v60 }
 0xd69   :  { %2083 = vmatpush1.msra.mxu1 %v3586_v36 }
 0xd6a   :  { %2084 = vmatprep.subr.mxu1 %v3592_v37 }
 0xd6b   :  { %2085 = vmatpush1.msra.mxu1 %v3598_v38 }
 0xd6c   :  { %2086 = vmatprep.subr.mxu1 %v3604_v39 }
 0xd6d   :  { %2087 = vmatpush1.msra.mxu1 %v3610_v40 }
 0xd6e   :  { %2088 = vmatprep.subr.mxu1 %v3616_v41 }
 0xd6f   :  { %2089 = vmatpush1.msra.mxu1 %v3622_v42 }
 0xd70   :  { %2090 = vmatprep.subr.mxu1 %v3628_v43 }
 0xd71   :  { %2091 = vmatpush1.msra.mxu1 %v3634_v44 }
 0xd72   :  { %2092 = vmatprep.subr.mxu1 %v3642_v45 }
 0xd73   :  { %2093 = vmatpush1.msra.mxu1 %v3651_v47 }
 0xd74   :  { %2094 = vmatprep.subr.mxu1 %v3660_v49 }
 0xd75   :  { %2095 = vmatpush1.msra.mxu1 %v3669_v51 }
 0xd76   :  { %2296 = vmatprep.subr.mxu1 %v3569_v62 }
 0xe26   :  { %v1923_v28 = vpop.f32.mrf.mxu1 }
 0xe27   :  { %v1929_v29 = vrot.slane %v1923_v28, 2 }
 0xe28   :  { %v1925_v34 = vpop.f32.mrf.mxu1 }
 0xe29   :  { %v1931_v30 = vadd.f32 %v1929_v29, %v3717_v1  ;;  %v1938_v35 = vadd.f32 %v3725_v15, %v1925_v34  ;;  %v1951_v1 = vrot.slane %v3788_v24, 6 }
 0xe2b   :  { %v2696_v31 = vmul.f32 -1.442695, %v1931_v30  ;;  %v1940_v61 = vrot.slane %v1938_v35, 2 }
 0xe2d   :  { %3080 = vpow2.f32 %v2696_v31 }
 0xe3a   :  { %v3081_v32 = vpop.eup %3080 }
 0xe3b   :  { %v1935_v33 = vadd.f32 1.0, %v3081_v32 }
 0xe3d   :  { %3082 = vrcp.f32 %v1935_v33 }
 0xe4a   :  { %v3083_v46 = vpop.eup %3082 }
 0xe4b   :  { %v1942_v48 = vmul.f32 %v3083_v46, %v1940_v61  ;;  %v1945_v62 = vsub.f32 1.0, %v3083_v46  ;;  %v1953_v55 = vmul.f32 %v3083_v46, %v1951_v1 }
 0xe4d   :  { %v1943_v50 = vadd.f32 %v1942_v48, %v3731_v20 }
 0xe4f   :  { %3084 = vtanh.f32 %v1943_v50 }
 0xe5c   :  { %v3085_v53 = vpop.eup %3084 }
 0xe5d   :  { %1947 = vrot.lane.b32.xlu0 %v3085_v53, %s3121_s18 }
 0xecf   :  { %v1948_v54 = vpop.permute.xlu0 %1947 }
 0xed0   :  { %v1950_v56 = vmul.f32 %v1948_v54, %v1945_v62 }
 0xed2   :  { %v3815_v57 = vadd.f32 %v1953_v55, %v1950_v56 }
 0xed4   :  { %v1961_v63 = vrot.slane %v3815_v57, 6 }
 0xed6   :  { %1962 = vrot.lane.b32.xlu1 %v1961_v63, %s3121_s18 }
 0xf48   :  { %v1963_v0 = vpop.permute.xlu1 %1962 }
 0xf49   :  { %2697 = vmatmul.mubr.msk.f32.vlgmr.msra.gmra.mxu0 %vm1431_vm2, %v1963_v0 }
 0xf4a   :  { %2189 = vmatpush1.msra.mxu0 %v3574_v59  ;;  %2236 = vmatprep.mubr.f32.mxu0 %v3120_v52 }
 0xf4b   :  { %2190 = vmatprep.subr.mxu0 %v3579_v60 }
 0xf4c   :  { %2191 = vmatpush1.msra.mxu0 %v3586_v36 }
 0xf4d   :  { %2192 = vmatprep.subr.mxu0 %v3592_v37 }
 0xf4e   :  { %2193 = vmatpush1.msra.mxu0 %v3598_v38 }
 0xf4f   :  { %2194 = vmatprep.subr.mxu0 %v3604_v39 }
 0xf50   :  { %2195 = vmatpush1.msra.mxu0 %v3610_v40 }
 0xf51   :  { %2196 = vmatprep.subr.mxu0 %v3616_v41 }
 0xf52   :  { %2197 = vmatpush1.msra.mxu0 %v3622_v42 }
 0xf53   :  { %2198 = vmatprep.subr.mxu0 %v3628_v43 }
 0xf54   :  { %2199 = vmatpush1.msra.mxu0 %v3634_v44 }
 0xf55   :  { %2200 = vmatprep.subr.mxu0 %v3642_v45 }
 0xf56   :  { %2201 = vmatpush1.msra.mxu0 %v3651_v47 }
 0xf57   :  { %2202 = vmatprep.subr.mxu0 %v3660_v49 }
 0xf58   :  { %2203 = vmatpush1.msra.mxu0 %v3669_v51 }
0x1009   :  { %v2032_v20 = vpop.f32.mrf.mxu0 }
0x100a   :  { %v2037_v3 = vadd.f32 %v2032_v20, %v3720_v11 }
0x100b   :  { %v2034_v10 = vpop.f32.mrf.mxu0 }
0x100c   :  { %v2698_v4 = vmul.f32 -1.442695, %v2037_v3  ;;  %v2044_v12 = vadd.f32 %v3725_v15, %v2034_v10 }
0x100e   :  { %3086 = vpow2.f32 %v2698_v4 }
0x101b   :  { %v3087_v8 = vpop.eup %3086 }
0x101c   :  { %v2041_v9 = vadd.f32 1.0, %v3087_v8 }
0x101e   :  { %3088 = vrcp.f32 %v2041_v9 }
0x102b   :  { %v3089_v13 = vpop.eup %3088 }
0x102c   :  { %v2045_v16 = vmul.f32 %v3089_v13, %v2044_v12  ;;  %v2048_v21 = vsub.f32 1.0, %v3089_v13  ;;  %v2055_v2 = vmul.f32 %v3089_v13, %v1961_v63 }
0x102e   :  { %v2046_v18 = vadd.f32 %v2045_v16, %v3840_v14 }
0x1030   :  { %3090 = vtanh.f32 %v2046_v18 }
0x103d   :  { %v3091_v19 = vpop.eup %3090 }
0x103e   :  { %2050 = vrot.lane.b32.xlu0 %v3091_v19, %s3121_s18 }
0x10b0   :  { %v2051_v22 = vpop.permute.xlu0 %2050 }
0x10b1   :  { %v2053_v23 = vmul.f32 %v2051_v22, %v2048_v21 }
0x10b3   :  { %v2056_v5 = vadd.f32 %v2055_v2, %v2053_v23 }
0x10b5   :  { %2058 = vrot.lane.b32.xlu1 %v2056_v5, %s3121_s18 }
0x1127   :  { %v2059_v6 = vpop.permute.xlu1 %2058 }
0x1128   :  { %2061 = vst.msk [vmem:[#allocation2 + $0x8] sm:$0x3] %vm1635_vm3, %v2059_v6  ;;  %2699 = vmatmul.mubr.msk.f32.vlgmr.msra.gmra.mxu1 %vm1431_vm2, %v2059_v6 }
0x1129   :  { %2297 = vmatpush1.msra.mxu1 %v3574_v59  ;;  %2344 = vmatprep.mubr.f32.mxu1 %v3120_v52 }
0x112a   :  { %2298 = vmatprep.subr.mxu1 %v3579_v60 }
0x112b   :  { %2299 = vmatpush1.msra.mxu1 %v3586_v36 }
0x112c   :  { %2300 = vmatprep.subr.mxu1 %v3592_v37 }
0x112d   :  { %2301 = vmatpush1.msra.mxu1 %v3598_v38 }
0x112e   :  { %2302 = vmatprep.subr.mxu1 %v3604_v39 }
0x112f   :  { %2303 = vmatpush1.msra.mxu1 %v3610_v40 }
0x1130   :  { %2304 = vmatprep.subr.mxu1 %v3616_v41 }
0x1131   :  { %2305 = vmatpush1.msra.mxu1 %v3622_v42  ;;  %v2158_v42 = vrot.slane %v2056_v5, 6 }
0x1132   :  { %2306 = vmatprep.subr.mxu1 %v3628_v43 }
0x1133   :  { %2307 = vmatpush1.msra.mxu1 %v3634_v44 }
0x1134   :  { %2308 = vmatprep.subr.mxu1 %v3642_v45 }
0x1135   :  { %2309 = vmatpush1.msra.mxu1 %v3651_v47 }
0x1136   :  { %2310 = vmatprep.subr.mxu1 %v3660_v49 }
0x1137   :  { %2311 = vmatpush1.msra.mxu1 %v3669_v51 }
0x11e8   :  { %v2130_v59 = vpop.f32.mrf.mxu1 }
0x11e9   :  { %v2136_v60 = vrot.slane %v2130_v59, 6  ;;  %v2391_v59 = vld [vmem:[%s4006_s21 + $0x30] sm:$0xff] }
0x11ea   :  { %v2132_v40 = vpop.f32.mrf.mxu1 }
0x11eb   :  { %v2138_v36 = vadd.f32 %v2136_v60, %v3720_v11  ;;  %v2145_v41 = vadd.f32 %v3725_v15, %v2132_v40  ;;  %v2388_v60 = vld [vmem:[%s4006_s21 + $0x18] sm:$0xff] }
0x11ed   :  { %v2700_v37 = vmul.f32 -1.442695, %v2138_v36  ;;  %v2147_v43 = vrot.slane %v2145_v41, 6  ;;  %v2386_v36 = vld [vmem:[%s4006_s21 + $0x8] sm:$0xff] }
0x11ef   :  { %3092 = vpow2.f32 %v2700_v37  ;;  %v2385_v37 = vld [vmem:[%s4006_s21] sm:$0xff] }
0x11fc   :  { %v3093_v38 = vpop.eup %3092 }
0x11fd   :  { %v2142_v39 = vadd.f32 1.0, %v3093_v38 }
0x11ff   :  { %3094 = vrcp.f32 %v2142_v39 }
0x120c   :  { %v3095_v44 = vpop.eup %3094 }
0x120d   :  { %v2149_v45 = vmul.f32 %v3095_v44, %v2147_v43  ;;  %v2160_v47 = vmul.f32 %v3095_v44, %v2158_v42  ;;  %v2152_v52 = vsub.f32 1.0, %v3095_v44 }
0x120f   :  { %v2150_v49 = vadd.f32 %v2149_v45, %v3840_v14 }
0x1211   :  { %3096 = vtanh.f32 %v2150_v49  ;;  %v2522_v49 = vld [vmem:[%s4007_s23 + $0x38] sm:$0xff] }
0x1212   :  { %3037 = vmatprep.subr.mxu1 %v2522_v49 }
0x121e   :  { %v3097_v51 = vpop.eup %3096 }
0x121f   :  { %2154 = vrot.lane.b32.xlu0 %v3097_v51, %s3121_s18  ;;  %v2521_v51 = vld [vmem:[%s4007_s23 + $0x30] sm:$0xff] }
0x1291   :  { %v2155_v17 = vpop.permute.xlu0 %2154 }
0x1292   :  { %v2157_v26 = vmul.f32 %v2155_v17, %v2152_v52  ;;  %v2520_v52 = vld [vmem:[%s4007_s23 + $0x28] sm:$0xff]  ;;  %v2519_v17 = vld [vmem:[%s4007_s23 + $0x20] sm:$0xff] }
0x1294   :  { %v3867_v7 = vadd.f32 %v2160_v47, %v2157_v26  ;;  %v2518_v26 = vld [vmem:[%s4007_s23 + $0x18] sm:$0xff] }
0x1296   :  { %v2167_v25 = vrot.slane %v3867_v7, 2  ;;  %v2266_v1 = vrot.slane %v3867_v7, 6 }
0x1298   :  { %2168 = vrot.lane.b32.xlu1 %v2167_v25, %s3121_s18  ;;  %v2705_v25 = vld [vmem:[%s4008_s22] ss:$0 sm:$0xff] }
0x130a   :  { %v2169_v27 = vpop.permute.xlu1 %2168 }
0x130b   :  { %2701 = vmatmul.mubr.msk.f32.vlgmr.msra.gmra.mxu0 %vm1431_vm2, %v2169_v27 }
0x13cb   :  { %v2238_v28 = vpop.f32.mrf.mxu0 }
0x13cc   :  { %v2244_v29 = vrot.slane %v2238_v28, 4 }
0x13cd   :  { %v2240_v34 = vpop.f32.mrf.mxu0 }
0x13ce   :  { %v2246_v30 = vadd.f32 %v2244_v29, %v3720_v11  ;;  %v2253_v35 = vadd.f32 %v3725_v15, %v2240_v34 }
0x13d0   :  { %v2702_v31 = vmul.f32 -1.442695, %v2246_v30  ;;  %v2255_v61 = vrot.slane %v2253_v35, 4 }
0x13d2   :  { %3098 = vpow2.f32 %v2702_v31 }
0x13df   :  { %v3099_v32 = vpop.eup %3098 }
0x13e0   :  { %v2250_v33 = vadd.f32 1.0, %v3099_v32 }
0x13e2   :  { %3100 = vrcp.f32 %v2250_v33 }
0x13ef   :  { %v3101_v46 = vpop.eup %3100 }
0x13f0   :  { %v2257_v48 = vmul.f32 %v3101_v46, %v2255_v61  ;;  %v2260_v62 = vsub.f32 1.0, %v3101_v46  ;;  %v2268_v55 = vmul.f32 %v3101_v46, %v2266_v1  ;;  %v2516_v46 = vld [vmem:[%s4007_s23 + $0x8] sm:$0xff] }
0x13f2   :  { %v2258_v50 = vadd.f32 %v2257_v48, %v3840_v14  ;;  %v2515_v48 = vld [vmem:[%s4007_s23] sm:$0xff] }
0x13f4   :  { %3102 = vtanh.f32 %v2258_v50 }
0x1401   :  { %v3103_v53 = vpop.eup %3102 }
0x1402   :  { %2262 = vrot.lane.b32.xlu0 %v3103_v53, %s3121_s18 }
0x1474   :  { %v2263_v54 = vpop.permute.xlu0 %2262 }
0x1475   :  { %v2265_v56 = vmul.f32 %v2263_v54, %v2260_v62 }
0x1477   :  { %v2269_v63 = vadd.f32 %v2268_v55, %v2265_v56 }
0x1479   :  { %v2275_v0 = vrot.slane %v2269_v63, 4  ;;  %v2374_v21 = vrot.slane %v2269_v63, 6 }
0x147b   :  { %2276 = vrot.lane.b32.xlu1 %v2275_v0, %s3121_s18 }
0x147f   :  { %1738 = vrot.lane.b32.xlu1 %v3761_v58, %s3121_s18 }
0x1483   :  { %1956 = vrot.lane.b32.xlu1 %v3815_v57, %s3121_s18 }
0x1487   :  { %2271 = vrot.lane.b32.xlu1 %v2269_v63, %s3121_s18 }
0x14ed   :  { %v2277_v20 = vpop.permute.xlu1 %2276 }
0x14ee   :  { %2703 = vmatmul.mubr.msk.f32.vlgmr.msra.gmra.mxu1 %vm1431_vm2, %v2277_v20 }
0x14ef   :  { %3038 = vmatpush3.msra.mxu1 %v2522_v49 }
0x14f0   :  { %3039 = vmatprep.subr.mxu1 %v2521_v51 }
0x14f1   :  { %v1739_v3 = vpop.permute.xlu1 %1738  ;;  %3040 = vmatpush3.msra.mxu1 %v2521_v51 }
0x14f2   :  { %1742 = vst.msk [vmem:[#allocation2] sm:$0xc] %vm1741_vm4, %v1739_v3  ;;  %3041 = vmatprep.subr.mxu1 %v2520_v52 }
0x14f3   :  { %3042 = vmatpush3.msra.mxu1 %v2520_v52 }
0x14f4   :  { %3043 = vmatprep.subr.mxu1 %v2519_v17 }
0x14f5   :  { %v1957_v4 = vpop.permute.xlu1 %1956  ;;  %3044 = vmatpush3.msra.mxu1 %v2519_v17 }
0x14f6   :  { %1960 = vst.msk [vmem:[#allocation2] sm:$0xc0] %vm1959_vm5, %v1957_v4  ;;  %3045 = vmatprep.subr.mxu1 %v2518_v26 }
0x14f7   :  { %3046 = vmatpush3.msra.mxu1 %v2518_v26 }
0x14f9   :  { %v2272_v8 = vpop.permute.xlu1 %2271 }
0x14fa   :  { %2274 = vst.msk [vmem:[#allocation2 + $0x8] sm:$0x30] %vm1850_vm6, %v2272_v8 }
0x15ae   :  { %v2346_v58 = vpop.f32.mrf.mxu1 }
0x15af   :  { %v2352_v9 = vrot.slane %v2346_v58, 2 }
0x15b0   :  { %v2348_v16 = vpop.f32.mrf.mxu1 }
0x15b1   :  { %v2354_v57 = vadd.f32 %v2352_v9, %v3720_v11  ;;  %v2361_v18 = vadd.f32 %v3725_v15, %v2348_v16  ;;  %v2392_v11 = vld [vmem:[%s4006_s21 + $0x38] sm:$0xff]  ;;  %v2390_v15 = vld [vmem:[%s4006_s21 + $0x28] sm:$0xff] }
0x15b2   :  { %3018 = vmatprep.subr.mxu0 %v2392_v11 }
0x15b3   :  { %v2704_v10 = vmul.f32 -1.442695, %v2354_v57  ;;  %v2363_v19 = vrot.slane %v2361_v18, 2  ;;  %3019 = vmatpush3.msra.mxu0 %v2392_v11 }
0x15b4   :  { %3020 = vmatprep.subr.mxu0 %v2391_v59 }
0x15b5   :  { %3104 = vpow2.f32 %v2704_v10  ;;  %3021 = vmatpush3.msra.mxu0 %v2391_v59  ;;  %v2710_v10 = vld [vmem:[%s4010_s24] ss:$0 sm:$0xff] }
0x15b6   :  { %3022 = vmatprep.subr.mxu0 %v2390_v15 }
0x15b7   :  { %3023 = vmatpush3.msra.mxu0 %v2390_v15 }
0x15c2   :  { %v3105_v12 = vpop.eup %3104 }
0x15c3   :  { %v2358_v13 = vadd.f32 1.0, %v3105_v12 }
0x15c5   :  { %3106 = vrcp.f32 %v2358_v13 }
0x15d2   :  { %v3107_v22 = vpop.eup %3106 }
0x15d3   :  { %v2365_v2 = vmul.f32 %v3107_v22, %v2363_v19  ;;  %v2376_v23 = vmul.f32 %v3107_v22, %v2374_v21  ;;  %v2368_v38 = vsub.f32 1.0, %v3107_v22 }
0x15d5   :  { %v2366_v5 = vadd.f32 %v2365_v2, %v3840_v14  ;;  %v2389_v14 = vld [vmem:[%s4006_s21 + $0x20] sm:$0xff] }
0x15d6   :  { %3024 = vmatprep.subr.mxu0 %v2389_v14 }
0x15d7   :  { %3108 = vtanh.f32 %v2366_v5  ;;  %3025 = vmatpush3.msra.mxu0 %v2389_v14 }
0x15d8   :  { %3026 = vmatprep.subr.mxu0 %v2388_v60 }
0x15d9   :  { %3027 = vmatpush3.msra.mxu0 %v2388_v60 }
0x15e4   :  { %v3109_v6 = vpop.eup %3108 }
0x15e5   :  { %2370 = vrot.lane.b32.xlu0 %v3109_v6, %s3121_s18 }
0x15e9   :  { %1847 = vrot.lane.b32.xlu0 %v3788_v24, %s3121_s18  ;;  %v2387_v24 = vld [vmem:[%s4006_s21 + $0x10] sm:$0xff] }
0x15ea   :  { %3028 = vmatprep.subr.mxu0 %v2387_v24 }
0x15eb   :  { %3029 = vmatpush3.msra.mxu0 %v2387_v24 }
0x15ec   :  { %3030 = vmatprep.subr.mxu0 %v2386_v36 }
0x15ed   :  { %2163 = vrot.lane.b32.xlu0 %v3867_v7, %s3121_s18  ;;  %3031 = vmatpush3.msra.mxu0 %v2386_v36  ;;  %v2517_v7 = vld [vmem:[%s4007_s23 + $0x10] sm:$0xff] }
0x15ee   :  { %3032 = vmatprep.subr.mxu0 %v2385_v37  ;;  %3047 = vmatprep.subr.mxu1 %v2517_v7 }
0x15ef   :  { %3033 = vmatpush3.msra.mxu0 %v2385_v37  ;;  %3048 = vmatpush3.msra.mxu1 %v2517_v7 }
0x15f0   :  { %3049 = vmatprep.subr.mxu1 %v2516_v46 }
0x15f1   :  { %3050 = vmatpush3.msra.mxu1 %v2516_v46 }
0x15f2   :  { %3051 = vmatprep.subr.mxu1 %v2515_v48 }
0x15f3   :  { %3052 = vmatpush3.msra.mxu1 %v2515_v48 }
0x1657   :  { %v2371_v39 = vpop.permute.xlu0 %2370 }
0x1658   :  { %v2373_v40 = vmul.f32 %v2371_v39, %v2368_v38 }
0x165a   :  { %v2377_v41 = vadd.f32 %v2376_v23, %v2373_v40 }
0x165b   :  { %v1848_v42 = vpop.permute.xlu0 %1847 }
0x165c   :  { %1851 = vst.msk [vmem:[#allocation2] sm:$0x30] %vm1850_vm6, %v1848_v42  ;;  %2379 = vrot.lane.b32.xlu0 %v2377_v41, %s3121_s18 }
0x165f   :  { %v2164_v43 = vpop.permute.xlu0 %2163 }
0x1660   :  { %2166 = vst.msk [vmem:[#allocation2 + $0x8] sm:$0xc] %vm1741_vm4, %v2164_v43 }
0x1663   :  { %v2383_v44 = vld [vmem:[#allocation2] sm:$0xff] }
0x1664   :  { %2497 = vrot.lane.b32.xlu1 %v2383_v44, %s3119_s5  ;;  %3034 = vmatprep.mubr.msk.f32.mxu0 %vm1431_vm2, %v2383_v44 }
0x16ce   :  { %v2380_v45 = vpop.permute.xlu0 %2379 }
0x16cf   :  { %2382 = vst.msk [vmem:[#allocation2 + $0x8] sm:$0xc0] %vm1959_vm5, %v2380_v45 }
0x16d6   :  { %v2384_v47 = vld [vmem:[#allocation2 + $0x8] sm:$0xff]  ;;  %v2498_v56 = vpop.permute.xlu1 %2497 }
0x16d7   :  { %2499 = vrot.lane.b32.xlu0 %v2384_v47, %s3119_s5  ;;  %3035 = vmatmul.mubr.msk.f32.vlgmr.msra.gmra.mxu0 %vm1431_vm2, %v2384_v47 }
0x1749   :  { %v2500_v54 = vpop.permute.xlu0 %2499 }
0x1797   :  { %v3036_v27 = vpop.f32.mrf.mxu0 }
0x1798   :  { %v2478_v28 = vadd.f32 %v3036_v27, %v2705_v25 }
0x1799   :  { %v2472_v29 = vpop.f32.mrf.mxu0 }
0x179a   :  { %v2709_v30 = vmul.f32 -1.442695, %v2478_v28  ;;  %2612 = vst.msk [vmem:[%s4009_s25 + $0x8] sm:$0xff] %vm1295_vm1, %v2478_v28  ;;  %v2473_v31 = vadd.f32 %v2705_v25, %v2472_v29 }
0x179c   :  { %3110 = vpow2.f32 %v2709_v30  ;;  %v2708_v32 = vmul.f32 -1.442695, %v2473_v31  ;;  %2611 = vst.msk [vmem:[%s4009_s25] sm:$0xff] %vm1295_vm1, %v2473_v31 }
0x179e   :  { %3112 = vpow2.f32 %v2708_v32 }
0x17a9   :  { %v3111_v33 = vpop.eup %3110 }
0x17aa   :  { %v2488_v34 = vadd.f32 1.0, %v3111_v33 }
0x17ab   :  { %v3113_v35 = vpop.eup %3112 }
0x17ac   :  { %3114 = vrcp.f32 %v2488_v34  ;;  %v2487_v61 = vadd.f32 1.0, %v3113_v35 }
0x17ae   :  { %3116 = vrcp.f32 %v2487_v61 }
0x17b9   :  { %v3115_v50 = vpop.eup %3114 }
0x17ba   :  { %v2494_v53 = vmul.f32 %v3115_v50, %v2384_v47  ;;  %v2496_v63 = vsub.f32 1.0, %v3115_v50 }
0x17bb   :  { %v3117_v62 = vpop.eup %3116 }
0x17bc   :  { %2509 = vrot.lane.b32.xlu0 %v2494_v53, %s3122_s11  ;;  %v2493_v1 = vmul.f32 %v3117_v62, %v2383_v44  ;;  %v2495_v55 = vsub.f32 1.0, %v3117_v62  ;;  %v2504_v3 = vmul.f32 %v2500_v54, %v2496_v63 }
0x17be   :  { %2507 = vrot.lane.b32.xlu1 %v2493_v1, %s3122_s11  ;;  %v2503_v20 = vmul.f32 %v2498_v56, %v2495_v55 }
0x17c0   :  { %2617 = vrot.lane.b32.xlu0 %v2478_v28, %s3123_s6 }
0x17c2   :  { %2615 = vrot.lane.b32.xlu1 %v2473_v31, %s3123_s6 }
0x182e   :  { %v2510_v0 = vpop.permute.xlu0 %2509 }
0x182f   :  { %v2514_v58 = vsel %vm99_vm0, %v2510_v0, %v2504_v3 }
0x1830   :  { %v2508_v4 = vpop.permute.xlu1 %2507 }
0x1831   :  { %v2513_v8 = vsel %vm99_vm0, %v2508_v4, %v2503_v20 }
0x1832   :  { %v2618_v9 = vpop.permute.xlu0 %2617  ;;  %3053 = vmatprep.mubr.msk.f32.mxu1 %vm1431_vm2, %v2513_v8 }
0x1833   :  { %2714 = vst.msk [vmem:[%s4009_s25 + $0x18] sm:$0xff] %vm1295_vm1, %v2618_v9  ;;  %3054 = vmatmul.mubr.msk.f32.vlgmr.msra.gmra.mxu1 %vm1431_vm2, %v2514_v58 }
0x1834   :  { %v2616_v57 = vpop.permute.xlu1 %2615 }
0x1835   :  { %2713 = vst.msk [vmem:[%s4009_s25 + $0x10] sm:$0xff] %vm1295_vm1, %v2616_v57 }
0x18f3   :  { %v3055_v12 = vpop.f32.mrf.mxu1 }
0x18f4   :  { %v2608_v13 = vadd.f32 %v3055_v12, %v2710_v10 }
0x18f5   :  { %v2602_v16 = vpop.f32.mrf.mxu1 }
0x18f6   :  { %2716 = vst.msk [vmem:[%s4009_s25 + $0x28] sm:$0xff] %vm1295_vm1, %v2608_v13  ;;  %v2603_v18 = vadd.f32 %v2710_v10, %v2602_v16 }
0x18f8   :  { %2715 = vst.msk [vmem:[%s4009_s25 + $0x20] sm:$0xff] %vm1295_vm1, %v2603_v18 }

</bundles_post_ra>
